<compile_context>
chip_gen: v7x
topology: tpu7x:2x2x1
jax: 0.10.0
libtpu: 0.0.40
codegen_flags: <defaults>
</compile_context>

<pallas_src>
import functools

import jax
import jax.numpy as jnp
from jax.experimental import pallas as pl
from jax.experimental.pallas import tpu as pltpu


LN_EPS = 1e-6        # matches nn.LayerNorm(embed_dim, eps=1e-06)
_NEG_INF = -1e30     # softmax mask value for padded key positions


def _round_up(n, m):
    return ((n + m - 1) // m) * m


def _pick_batch_block(batch):
    """Largest divisor of `batch` that keeps the parallel grid extent >= 2,
    so both v7x TensorCores get work (on v5e/v6e the extra grid step costs
    ~0.35us while rows-per-step stay as large as possible)."""
    if batch < 2:
        return batch
    bt = batch // 2
    while batch % bt:
        bt -= 1
    return bt


# ----------------------------------------------------------------------------
# In-kernel helpers
# ----------------------------------------------------------------------------
def _layer_norm(v, g, b, eps=LN_EPS):
    # f32 statistics (v is f32 when called).
    mu = jnp.mean(v, axis=-1, keepdims=True)
    var = jnp.mean((v - mu) ** 2, axis=-1, keepdims=True)
    return (v - mu) * jax.lax.rsqrt(var + eps) * g + b


# ----------------------------------------------------------------------------
# The fused ViT kernel: patch-embed -> depth x encoder block -> LN -> head
# ----------------------------------------------------------------------------
def _vit_kernel(patches_ref, patch_w_ref, base_ref,
                g1_ref, b1_ref, wqkv_ref, bqkv_ref, wproj_ref, bproj_ref,
                g2_ref, b2_ref, wfc1_ref, bfc1_ref, wfc2_ref, bfc2_ref,
                lnf_g_ref, lnf_b_ref, headw_ref, headb_ref,
                out_ref, tok_sc,
                *, num_heads, n_valid):
    d = pl.program_id(1)
    depth = pl.num_programs(1)

    bt, Np, pd = patches_ref.shape
    D = patch_w_ref.shape[1]
    hd = D // num_heads
    R = bt * Np
    scale = float(hd) ** -0.5
    f32 = jnp.float32
    bf16 = jnp.bfloat16

    # ---- first depth step: fused patch embedding + cls / pos composition -----
    # `base` already holds cls+pos (row 0), pos+patch_bias (patch rows) and
    # zeros (padded rows); the cls/pad rows of `patches` are zero, so the
    # matmul contributes nothing there.  No concatenate, no masked stores.
    @pl.when(d == 0)
    def _embed():
        px = patches_ref[...].reshape(R, pd)
        pe = jnp.dot(px.astype(bf16), patch_w_ref[...],
                     preferred_element_type=f32)                     # (R, D)
        tok_sc[...] = (pe.reshape(bt, Np, D) + base_ref[...]).reshape(R, D)

    x = tok_sc[...]                                                  # (R, D) f32

    # ---- attention: LN1 + fused QKV (one wide MXU call over all rows) --------
    h1 = _layer_norm(x, g1_ref[0], b1_ref[0])
    qkv = jnp.dot(h1.astype(bf16), wqkv_ref[0],
                  preferred_element_type=f32) + bqkv_ref[0]          # (R, 3D)

    # vreg-aligned 128-lane slices (D == 128); 1/sqrt(hd) folded into q.
    q = qkv[:, :D] * scale
    k = qkv[:, D:2 * D]
    v = qkv[:, 2 * D:]

    key_valid = jax.lax.broadcasted_iota(jnp.int32, (1, 1, Np), 2) < n_valid
    wproj = wproj_ref[0]                                             # (D, D) bf16

    # Per-head attention stays in registers (no VMEM scratch, no head concat):
    # each head is contracted straight into the output projection, so the head
    # merge is done by the MXU.  Static unroll over num_heads (= 4 here).
    attn = jnp.zeros((R, D), f32)
    for h in range(num_heads):
        sl = slice(h * hd, (h + 1) * hd)
        qh = q[:, sl].reshape(bt, Np, hd).astype(bf16)
        kh = k[:, sl].reshape(bt, Np, hd).astype(bf16)
        vh = v[:, sl].reshape(bt, Np, hd).astype(bf16)
        s = jnp.einsum("bqd,bkd->bqk", qh, kh,
                       preferred_element_type=f32)                   # (bt,Np,Np)
        s = jnp.where(key_valid, s, _NEG_INF)                        # mask pads
        s = s - jnp.max(s, axis=-1, keepdims=True)
        p = jnp.exp(s)
        p = p * pl.reciprocal(jnp.sum(p, axis=-1, keepdims=True), approx=True)
        oh = jnp.einsum("bqk,bkd->bqd", p.astype(bf16), vh,
                        preferred_element_type=f32)                  # (bt,Np,hd)
        attn = attn + jnp.dot(oh.reshape(R, hd).astype(bf16), wproj[sl, :],
                              preferred_element_type=f32)            # (R, D)

    x = x + attn + bproj_ref[0]                                      # residual

    # ---- MLP ------------------------------------------------------------------
    h2 = _layer_norm(x, g2_ref[0], b2_ref[0])
    f1 = jnp.dot(h2.astype(bf16), wfc1_ref[0],
                 preferred_element_type=f32) + bfc1_ref[0]
    # TODO(synk): PyTorch nn.GELU() is the exact erf formulation; using the tanh
    # approximation since erf lowering is not guaranteed in Mosaic.
    f1 = jax.nn.gelu(f1, approximate=True)
    f2 = jnp.dot(f1.astype(bf16), wfc2_ref[0],
                 preferred_element_type=f32) + bfc2_ref[0]
    x = x + f2

    tok_sc[...] = x                                                  # stays in VMEM

    # ---- last depth step: final LayerNorm on the cls row + classifier head ---
    @pl.when(d == depth - 1)
    def _head():
        cls_rows = x.reshape(bt, Np, D)[:, 0, :]                     # (bt, D)
        hf = _layer_norm(cls_rows, lnf_g_ref[...], lnf_b_ref[...])
        logits = jnp.dot(hf.astype(bf16), headw_ref[...],
                         preferred_element_type=f32) + headb_ref[...]
        out_ref[0] = logits.astype(out_ref.dtype)


# ----------------------------------------------------------------------------
# Wrapper: one pallas_call for the whole forward
# ----------------------------------------------------------------------------
def vit_forward(x, prep, *, patch_size, num_heads, n_valid, num_classes,
                batch_block=None):
    B = x.shape[0]
    pd, D = prep["patch_w"].shape
    depth = prep["w_qkv"].shape[0]
    Hd = prep["w_fc1"].shape[2]
    Np = prep["base"].shape[1]
    Cp = prep["head_w"].shape[1]

    # Patch pixel extraction (pure layout, matches PyTorch PatchEmbed exactly),
    # then pad into the token grid: row 0 = cls slot, rows 1..P = patches,
    # remaining rows = padding (all zero pixels).
    _, C, H, W = x.shape
    ph, pw = H // patch_size, W // patch_size
    n_patches = ph * pw
    patches = x.reshape(B, C, ph, patch_size, pw, patch_size)
    patches = jnp.transpose(patches, (0, 2, 4, 1, 3, 5)).reshape(B, n_patches, pd)
    patches = jnp.pad(patches, ((0, 0), (1, Np - 1 - n_patches), (0, 0)))

    bt = _pick_batch_block(B) if batch_block is None else batch_block
    if B % bt:
        bt = B
    n_bt = B // bt
    grid = (n_bt, depth)

    kernel = functools.partial(_vit_kernel, num_heads=num_heads, n_valid=n_valid)

    def fixed(shape):                       # replicated input (constant index)
        nd = len(shape)
        return pl.BlockSpec(shape, lambda bi, d: (0,) * nd)

    def perlayer(shape):                    # stacked per-layer weights, index by d
        nd = len(shape)
        return pl.BlockSpec((1,) + tuple(shape[1:]),
                            lambda bi, d: (d,) + (0,) * (nd - 1))

    in_specs = [
        pl.BlockSpec((bt, Np, pd), lambda bi, d: (bi, 0, 0)),   # patch pixels
        fixed((pd, D)),                                          # patch_w
        fixed((1, Np, D)),                                       # base (cls/pos/bias)
        perlayer((depth, 1, D)), perlayer((depth, 1, D)),        # ln1 g, b
        perlayer((depth, D, 3 * D)), perlayer((depth, 1, 3 * D)),# qkv w, b
        perlayer((depth, D, D)), perlayer((depth, 1, D)),        # proj w, b
        perlayer((depth, 1, D)), perlayer((depth, 1, D)),        # ln2 g, b
        perlayer((depth, D, Hd)), perlayer((depth, 1, Hd)),      # fc1 w, b
        perlayer((depth, Hd, D)), perlayer((depth, 1, D)),       # fc2 w, b
        fixed((1, D)), fixed((1, D)),                            # final ln g, b
        fixed((D, Cp)), fixed((1, Cp)),                          # head w, b
    ]

    out = pl.pallas_call(
        kernel,
        out_shape=jax.ShapeDtypeStruct((n_bt, bt, Cp), jnp.float32),
        grid=grid,
        in_specs=in_specs,
        out_specs=pl.BlockSpec((1, bt, Cp), lambda bi, d: (bi, 0, 0)),
        scratch_shapes=[pltpu.VMEM((bt * Np, D), jnp.float32)],  # resident tokens
        compiler_params=pltpu.CompilerParams(
            dimension_semantics=("parallel", "arbitrary")),
    )(patches, prep["patch_w"], prep["base"],
      prep["ln1_g"], prep["ln1_b"], prep["w_qkv"], prep["b_qkv"],
      prep["w_proj"], prep["b_proj"], prep["ln2_g"], prep["ln2_b"],
      prep["w_fc1"], prep["b_fc1"], prep["w_fc2"], prep["b_fc2"],
      prep["ln_g"], prep["ln_b"], prep["head_w"], prep["head_b"])

    return out.reshape(B, Cp)[:, :num_classes]


# ----------------------------------------------------------------------------
# One-time parameter preparation (bf16 casts, stacking, padding, cls/pos fold)
# ----------------------------------------------------------------------------
def prepare_params(params, *, n_pad):
    pd, D = params["patch_w"].shape
    depth = len(params["blocks"])
    Hd = params["blocks"][0]["w_fc1"].shape[1]
    C = params["head_w"].shape[1]
    Cp = _round_up(max(C, 128), 128)            # lane-dense classifier width
    num_patches = params["pos_embed"].shape[1] - 1
    bf, f32 = jnp.bfloat16, jnp.float32

    def stack(name):
        return jnp.stack([blk[name] for blk in params["blocks"]])

    # Fused "base" token tensor: row0 = cls + pos[0]; patch rows = pos + patch
    # bias; padded rows = 0.  Lets the kernel skip concat / pos-add plumbing.
    base = jnp.zeros((1, n_pad, D), f32)
    base = base.at[0, 0, :].set(params["cls_token"].reshape(D)
                                + params["pos_embed"][0, 0])
    base = base.at[0, 1:1 + num_patches, :].set(
        params["pos_embed"][0, 1:] + params["patch_b"][None, :])

    return {
        "patch_w": params["patch_w"].astype(bf),
        "base": base,
        "ln1_g": stack("ln1_g").reshape(depth, 1, D).astype(f32),
        "ln1_b": stack("ln1_b").reshape(depth, 1, D).astype(f32),
        "w_qkv": stack("w_qkv").astype(bf),
        "b_qkv": stack("b_qkv").reshape(depth, 1, 3 * D).astype(f32),
        "w_proj": stack("w_proj").astype(bf),
        "b_proj": stack("b_proj").reshape(depth, 1, D).astype(f32),
        "ln2_g": stack("ln2_g").reshape(depth, 1, D).astype(f32),
        "ln2_b": stack("ln2_b").reshape(depth, 1, D).astype(f32),
        "w_fc1": stack("w_fc1").astype(bf),
        "b_fc1": stack("b_fc1").reshape(depth, 1, Hd).astype(f32),
        "w_fc2": stack("w_fc2").astype(bf),
        "b_fc2": stack("b_fc2").reshape(depth, 1, D).astype(f32),
        "ln_g": params["ln_g"].reshape(1, D).astype(f32),
        "ln_b": params["ln_b"].reshape(1, D).astype(f32),
        "head_w": jnp.zeros((D, Cp), f32).at[:, :C].set(params["head_w"]).astype(bf),
        "head_b": jnp.zeros((1, Cp), f32).at[0, :C].set(params["head_b"]),
    }


# ----------------------------------------------------------------------------
# Deterministic parameter initialization (mirrors the PyTorch __init__)
# ----------------------------------------------------------------------------
def _xavier_uniform(key, fan_in, fan_out):
    bound = (6.0 / (fan_in + fan_out)) ** 0.5
    return jax.random.uniform(key, (fan_in, fan_out), jnp.float32, -bound, bound)


def init_params(key, *, patch_dim, embed_dim, hidden_dim, depth,
                num_patches, num_classes):
    keys = jax.random.split(key, depth + 5)
    params = {
        "patch_w": _xavier_uniform(keys[0], patch_dim, embed_dim),
        "patch_b": jnp.zeros((embed_dim,), jnp.float32),
        "cls_token": 0.02 * jax.random.truncated_normal(
            keys[1], -2.0, 2.0, (1, 1, embed_dim), jnp.float32),
        "pos_embed": 0.02 * jax.random.truncated_normal(
            keys[2], -2.0, 2.0, (1, num_patches + 1, embed_dim), jnp.float32),
        "ln_g": jnp.ones((embed_dim,), jnp.float32),
        "ln_b": jnp.zeros((embed_dim,), jnp.float32),
        "head_w": _xavier_uniform(keys[3], embed_dim, num_classes),
        "head_b": jnp.zeros((num_classes,), jnp.float32),
    }
    blocks = []
    for d in range(depth):
        bk = jax.random.split(keys[4 + d], 8)
        blocks.append({
            "ln1_g": jnp.ones((embed_dim,), jnp.float32),
            "ln1_b": jnp.zeros((embed_dim,), jnp.float32),
            "w_qkv": _xavier_uniform(bk[0], embed_dim, 3 * embed_dim),
            "b_qkv": 1e-6 * jax.random.normal(bk[1], (3 * embed_dim,), jnp.float32),
            "w_proj": _xavier_uniform(bk[2], embed_dim, embed_dim),
            "b_proj": 1e-6 * jax.random.normal(bk[3], (embed_dim,), jnp.float32),
            "ln2_g": jnp.ones((embed_dim,), jnp.float32),
            "ln2_b": jnp.zeros((embed_dim,), jnp.float32),
            "w_fc1": _xavier_uniform(bk[4], embed_dim, hidden_dim),
            "b_fc1": 1e-6 * jax.random.normal(bk[5], (hidden_dim,), jnp.float32),
            "w_fc2": _xavier_uniform(bk[6], hidden_dim, embed_dim),
            "b_fc2": 1e-6 * jax.random.normal(bk[7], (embed_dim,), jnp.float32),
        })
    params["blocks"] = blocks
    return params


# ----------------------------------------------------------------------------
if __name__ == "__main__":
    # Small ViT configuration consistent with the module's forward pass.
    # embed_dim=128 keeps the feature dim lane-dense (multiple of 128).
    B, C, H, W = 2, 3, 16, 16
    patch_size = 4
    embed_dim = 128
    depth = 2
    num_heads = 4
    mlp_ratio = 4.0
    num_classes = 10

    num_patches = (H // patch_size) * (W // patch_size)     # 16 -> 17 tokens
    patch_dim = patch_size * patch_size * C                 # 48
    hidden_dim = int(embed_dim * mlp_ratio)                 # 512
    n_valid = num_patches + 1                               # cls + patches
    n_pad = _round_up(n_valid, 16)                          # 17 -> 32 tokens

    key = jax.random.PRNGKey(0)
    k_x, k_p = jax.random.split(key)
    x = jax.random.normal(k_x, (B, C, H, W), jnp.float32)   # NCHW, like PyTorch
    params = init_params(k_p, patch_dim=patch_dim, embed_dim=embed_dim,
                         hidden_dim=hidden_dim, depth=depth,
                         num_patches=num_patches, num_classes=num_classes)
    prep = prepare_params(params, n_pad=n_pad)              # one-time bf16 / pad

    fwd = jax.jit(functools.partial(vit_forward, patch_size=patch_size,
                                    num_heads=num_heads, n_valid=n_valid,
                                    num_classes=num_classes))
    logits = fwd(x, prep)
    jax.block_until_ready(logits)
    assert logits.shape == (B, num_classes), logits.shape
    assert bool(jnp.all(jnp.isfinite(logits)))
    print("KERNEL_OK")
</pallas_src>

<mosaic_0001>
module attributes {stable_mosaic.version = 11 : i64} {
  func.func @_vit_kernel(%arg0: i32, %arg1: i32, %arg2: memref<1x32x48xf32, #tpu.memory_space<vmem>>, %arg3: memref<48x128xbf16, #tpu.memory_space<vmem>>, %arg4: memref<1x32x128xf32, #tpu.memory_space<vmem>>, %arg5: memref<1x1x128xf32, #tpu.memory_space<vmem>>, %arg6: memref<1x1x128xf32, #tpu.memory_space<vmem>>, %arg7: memref<1x128x384xbf16, #tpu.memory_space<vmem>>, %arg8: memref<1x1x384xf32, #tpu.memory_space<vmem>>, %arg9: memref<1x128x128xbf16, #tpu.memory_space<vmem>>, %arg10: memref<1x1x128xf32, #tpu.memory_space<vmem>>, %arg11: memref<1x1x128xf32, #tpu.memory_space<vmem>>, %arg12: memref<1x1x128xf32, #tpu.memory_space<vmem>>, %arg13: memref<1x128x512xbf16, #tpu.memory_space<vmem>>, %arg14: memref<1x1x512xf32, #tpu.memory_space<vmem>>, %arg15: memref<1x512x128xbf16, #tpu.memory_space<vmem>>, %arg16: memref<1x1x128xf32, #tpu.memory_space<vmem>>, %arg17: memref<1x128xf32, #tpu.memory_space<vmem>>, %arg18: memref<1x128xf32, #tpu.memory_space<vmem>>, %arg19: memref<128x128xbf16, #tpu.memory_space<vmem>>, %arg20: memref<1x128xf32, #tpu.memory_space<vmem>>, %arg21: memref<1x1x128xf32, #tpu.memory_space<vmem>>, %arg22: memref<32x128xf32, #tpu.memory_space<vmem>>) attributes {dimension_semantics = [#tpu.dimension_semantics<parallel>, #tpu.dimension_semantics<arbitrary>], iteration_bounds = array<i64: 2, 2>, scalar_prefetch = 0 : i64, scratch_operands = 1 : i64, tpu.core_type = #tpu.core_type<tc>, window_params = [{transform_indices = @transform_0, window_bounds = array<i64: 1, 32, 48>}, {pipeline_mode = #tpu.pipeline_mode<synchronous>, transform_indices = @transform_1, window_bounds = array<i64: 48, 128>}, {pipeline_mode = #tpu.pipeline_mode<synchronous>, transform_indices = @transform_2, window_bounds = array<i64: 1, 32, 128>}, {transform_indices = @transform_3, window_bounds = array<i64: 1, 1, 128>}, {transform_indices = @transform_4, window_bounds = array<i64: 1, 1, 128>}, {transform_indices = @transform_5, window_bounds = array<i64: 1, 128, 384>}, {transform_indices = @transform_6, window_bounds = array<i64: 1, 1, 384>}, {transform_indices = @transform_7, window_bounds = array<i64: 1, 128, 128>}, {transform_indices = @transform_8, window_bounds = array<i64: 1, 1, 128>}, {transform_indices = @transform_9, window_bounds = array<i64: 1, 1, 128>}, {transform_indices = @transform_10, window_bounds = array<i64: 1, 1, 128>}, {transform_indices = @transform_11, window_bounds = array<i64: 1, 128, 512>}, {transform_indices = @transform_12, window_bounds = array<i64: 1, 1, 512>}, {transform_indices = @transform_13, window_bounds = array<i64: 1, 512, 128>}, {transform_indices = @transform_14, window_bounds = array<i64: 1, 1, 128>}, {pipeline_mode = #tpu.pipeline_mode<synchronous>, transform_indices = @transform_15, window_bounds = array<i64: 1, 128>}, {pipeline_mode = #tpu.pipeline_mode<synchronous>, transform_indices = @transform_16, window_bounds = array<i64: 1, 128>}, {pipeline_mode = #tpu.pipeline_mode<synchronous>, transform_indices = @transform_17, window_bounds = array<i64: 128, 128>}, {pipeline_mode = #tpu.pipeline_mode<synchronous>, transform_indices = @transform_18, window_bounds = array<i64: 1, 128>}, {transform_indices = @transform_19, window_bounds = array<i64: 1, 1, 128>}]} {
    %c0_i32 = arith.constant 0 : i32
    %0 = arith.cmpi eq, %arg1, %c0_i32 : i32
    %1 = arith.extui %0 : i1 to i32
    %c0_i32_0 = arith.constant 0 : i32
    %2 = arith.cmpi ne, %1, %c0_i32_0 : i32
    scf.if %2 {
      %c0_83 = arith.constant 0 : index
      %c0_84 = arith.constant 0 : index
      %c0_85 = arith.constant 0 : index
      %238 = vector.load %arg2[%c0_83, %c0_84, %c0_85] : memref<1x32x48xf32, #tpu.memory_space<vmem>>, vector<1x32x48xf32>
      %239 = vector.shape_cast %238 : vector<1x32x48xf32> to vector<32x48xf32>
      %240 = arith.truncf %239 : vector<32x48xf32> to vector<32x48xbf16>
      %c0_86 = arith.constant 0 : index
      %c0_87 = arith.constant 0 : index
      %241 = vector.load %arg3[%c0_86, %c0_87] : memref<48x128xbf16, #tpu.memory_space<vmem>>, vector<48x128xbf16>
      %cst_88 = arith.constant dense<0.000000e+00> : vector<32x128xf32>
      %242 = tpu.matmul %240, %241, %cst_88 {dimension_numbers = #tpu.dot_dimension_numbers<[1], [0], [0], [1], [0, 0, 1, 1], [], []>} : vector<32x48xbf16>, vector<48x128xbf16>, vector<32x128xf32> -> vector<32x128xf32>
      %243 = vector.shape_cast %242 : vector<32x128xf32> to vector<1x32x128xf32>
      %c0_89 = arith.constant 0 : index
      %c0_90 = arith.constant 0 : index
      %c0_91 = arith.constant 0 : index
      %244 = vector.load %arg4[%c0_89, %c0_90, %c0_91] : memref<1x32x128xf32, #tpu.memory_space<vmem>>, vector<1x32x128xf32>
      %245 = arith.addf %243, %244 : vector<1x32x128xf32>
      %246 = vector.shape_cast %245 : vector<1x32x128xf32> to vector<32x128xf32>
      %c0_92 = arith.constant 0 : index
      %c0_93 = arith.constant 0 : index
      %247 = vector.load %arg22[%c0_92, %c0_93] : memref<32x128xf32, #tpu.memory_space<vmem>>, vector<32x128xf32>
      tpu.vector_store %arg22[%c0_92, %c0_93], %246 {strides = array<i32>} : memref<32x128xf32, #tpu.memory_space<vmem>>, vector<32x128xf32>,
    } else {
    }
    %c0 = arith.constant 0 : index
    %c0_1 = arith.constant 0 : index
    %3 = vector.load %arg22[%c0, %c0_1] : memref<32x128xf32, #tpu.memory_space<vmem>>, vector<32x128xf32>
    %c0_2 = arith.constant 0 : index
    %c0_3 = arith.constant 0 : index
    %c0_4 = arith.constant 0 : index
    %4 = vector.load %arg5[%c0_2, %c0_3, %c0_4] : memref<1x1x128xf32, #tpu.memory_space<vmem>>, vector<1x1x128xf32>
    %5 = vector.shape_cast %4 : vector<1x1x128xf32> to vector<1x128xf32>
    %c0_5 = arith.constant 0 : index
    %c0_6 = arith.constant 0 : index
    %c0_7 = arith.constant 0 : index
    %6 = vector.load %arg6[%c0_5, %c0_6, %c0_7] : memref<1x1x128xf32, #tpu.memory_space<vmem>>, vector<1x1x128xf32>
    %7 = vector.shape_cast %6 : vector<1x1x128xf32> to vector<1x128xf32>
    %cst = arith.constant dense<0.000000e+00> : vector<32xf32>
    %8 = vector.multi_reduction <add>, %3, %cst [1] : vector<32x128xf32> to vector<32xf32>
    %9 = vector.shape_cast %8 : vector<32xf32> to vector<32x1xf32>
    %cst_8 = arith.constant 1.280000e+02 : f32
    %10 = vector.broadcast %cst_8 : f32 to vector<32x1xf32>
    %11 = arith.divf %9, %10 : vector<32x1xf32>
    %12 = vector.broadcast %11 : vector<32x1xf32> to vector<32x128xf32>
    %13 = arith.subf %3, %12 : vector<32x128xf32>
    %14 = arith.mulf %13, %13 : vector<32x128xf32>
    %cst_9 = arith.constant dense<0.000000e+00> : vector<32xf32>
    %15 = vector.multi_reduction <add>, %14, %cst_9 [1] : vector<32x128xf32> to vector<32xf32>
    %16 = vector.shape_cast %15 : vector<32xf32> to vector<32x1xf32>
    %cst_10 = arith.constant 1.280000e+02 : f32
    %17 = vector.broadcast %cst_10 : f32 to vector<32x1xf32>
    %18 = arith.divf %16, %17 : vector<32x1xf32>
    %19 = vector.broadcast %11 : vector<32x1xf32> to vector<32x128xf32>
    %20 = arith.subf %3, %19 : vector<32x128xf32>
    %cst_11 = arith.constant 9.99999997E-7 : f32
    %21 = vector.broadcast %cst_11 : f32 to vector<32x1xf32>
    %22 = arith.addf %18, %21 : vector<32x1xf32>
    %23 = math.rsqrt %22 : vector<32x1xf32>
    %24 = vector.broadcast %23 : vector<32x1xf32> to vector<32x128xf32>
    %25 = arith.mulf %20, %24 : vector<32x128xf32>
    %26 = vector.broadcast %5 : vector<1x128xf32> to vector<32x128xf32>
    %27 = arith.mulf %25, %26 : vector<32x128xf32>
    %28 = vector.broadcast %7 : vector<1x128xf32> to vector<32x128xf32>
    %29 = arith.addf %27, %28 : vector<32x128xf32>
    %30 = arith.truncf %29 : vector<32x128xf32> to vector<32x128xbf16>
    %c0_12 = arith.constant 0 : index
    %c0_13 = arith.constant 0 : index
    %c0_14 = arith.constant 0 : index
    %31 = vector.load %arg7[%c0_12, %c0_13, %c0_14] : memref<1x128x384xbf16, #tpu.memory_space<vmem>>, vector<1x128x384xbf16>
    %32 = vector.shape_cast %31 : vector<1x128x384xbf16> to vector<128x384xbf16>
    %cst_15 = arith.constant dense<0.000000e+00> : vector<32x384xf32>
    %33 = tpu.matmul %30, %32, %cst_15 {dimension_numbers = #tpu.dot_dimension_numbers<[1], [0], [0], [1], [0, 0, 1, 1], [], []>} : vector<32x128xbf16>, vector<128x384xbf16>, vector<32x384xf32> -> vector<32x384xf32>
    %c0_16 = arith.constant 0 : index
    %c0_17 = arith.constant 0 : index
    %c0_18 = arith.constant 0 : index
    %34 = vector.load %arg8[%c0_16, %c0_17, %c0_18] : memref<1x1x384xf32, #tpu.memory_space<vmem>>, vector<1x1x384xf32>
    %35 = vector.shape_cast %34 : vector<1x1x384xf32> to vector<1x384xf32>
    %36 = vector.broadcast %35 : vector<1x384xf32> to vector<32x384xf32>
    %37 = arith.addf %33, %36 : vector<32x384xf32>
    %38 = vector.extract_strided_slice %37 {offsets = [0, 0], sizes = [32, 128], strides = [1, 1]} : vector<32x384xf32> to vector<32x128xf32>
    %cst_19 = arith.constant 0.176776692 : f32
    %39 = vector.broadcast %cst_19 : f32 to vector<32x128xf32>
    %40 = arith.mulf %38, %39 : vector<32x128xf32>
    %41 = vector.extract_strided_slice %37 {offsets = [0, 128], sizes = [32, 128], strides = [1, 1]} : vector<32x384xf32> to vector<32x128xf32>
    %42 = vector.extract_strided_slice %37 {offsets = [0, 256], sizes = [32, 128], strides = [1, 1]} : vector<32x384xf32> to vector<32x128xf32>
    %43 = tpu.iota {dimensions = array<i32: 2>} : vector<1x1x32xi32>
    %c17_i32 = arith.constant 17 : i32
    %44 = vector.broadcast %c17_i32 : i32 to vector<1x1x32xi32>
    %45 = arith.cmpi slt, %43, %44 : vector<1x1x32xi32>
    %c0_20 = arith.constant 0 : index
    %c0_21 = arith.constant 0 : index
    %c0_22 = arith.constant 0 : index
    %46 = vector.load %arg9[%c0_20, %c0_21, %c0_22] : memref<1x128x128xbf16, #tpu.memory_space<vmem>>, vector<1x128x128xbf16>
    %47 = vector.shape_cast %46 : vector<1x128x128xbf16> to vector<128x128xbf16>
    %cst_23 = arith.constant 0.000000e+00 : f32
    %48 = vector.broadcast %cst_23 : f32 to vector<32x128xf32>
    %49 = vector.extract_strided_slice %40 {offsets = [0, 0], sizes = [32, 32], strides = [1, 1]} : vector<32x128xf32> to vector<32x32xf32>
    %50 = vector.shape_cast %49 : vector<32x32xf32> to vector<1x32x32xf32>
    %51 = arith.truncf %50 : vector<1x32x32xf32> to vector<1x32x32xbf16>
    %52 = vector.extract_strided_slice %41 {offsets = [0, 0], sizes = [32, 32], strides = [1, 1]} : vector<32x128xf32> to vector<32x32xf32>
    %53 = vector.shape_cast %52 : vector<32x32xf32> to vector<1x32x32xf32>
    %54 = arith.truncf %53 : vector<1x32x32xf32> to vector<1x32x32xbf16>
    %55 = vector.extract_strided_slice %42 {offsets = [0, 0], sizes = [32, 32], strides = [1, 1]} : vector<32x128xf32> to vector<32x32xf32>
    %56 = vector.shape_cast %55 : vector<32x32xf32> to vector<1x32x32xf32>
    %57 = arith.truncf %56 : vector<1x32x32xf32> to vector<1x32x32xbf16>
    "tpu.trace_start"() <{level = 10 : i32, message = "bqd,bkd->bqk"}> : () -> ()
    %cst_24 = arith.constant dense<0.000000e+00> : vector<1x32x32xf32>
    %58 = tpu.matmul %51, %54, %cst_24 {dimension_numbers = #tpu.dot_dimension_numbers<[2], [2], [1], [1], [0, 0, 0, 1, 1, 1], [0], [0]>} : vector<1x32x32xbf16>, vector<1x32x32xbf16>, vector<1x32x32xf32> -> vector<1x32x32xf32>
    %cst_25 = arith.constant -1.000000e+30 : f32
    "tpu.trace_stop"() : () -> ()
    %59 = vector.shape_cast %45 : vector<1x1x32xi1> to vector<1x1x32xi1>
    %60 = vector.broadcast %59 : vector<1x1x32xi1> to vector<1x32x32xi1>
    %61 = vector.broadcast %cst_25 : f32 to vector<1x32x32xf32>
    %62 = arith.select %60, %58, %61 : vector<1x32x32xi1>, vector<1x32x32xf32>
    %cst_26 = arith.constant dense<0xFF800000> : vector<1x32xf32>
    %63 = vector.multi_reduction <maximumf>, %62, %cst_26 [2] : vector<1x32x32xf32> to vector<1x32xf32>
    %64 = vector.shape_cast %63 : vector<1x32xf32> to vector<1x32x1xf32>
    %65 = vector.broadcast %64 : vector<1x32x1xf32> to vector<1x32x32xf32>
    %66 = arith.subf %62, %65 : vector<1x32x32xf32>
    %67 = math.exp %66 : vector<1x32x32xf32>
    %cst_27 = arith.constant dense<0.000000e+00> : vector<1x32xf32>
    %68 = vector.multi_reduction <add>, %67, %cst_27 [2] : vector<1x32x32xf32> to vector<1x32xf32>
    %69 = vector.shape_cast %68 : vector<1x32xf32> to vector<1x32x1xf32>
    %70 = tpu.reciprocal %69 {approx = true} : vector<1x32x1xf32> -> vector<1x32x1xf32>
    %71 = vector.broadcast %70 : vector<1x32x1xf32> to vector<1x32x32xf32>
    %72 = arith.mulf %67, %71 : vector<1x32x32xf32>
    %73 = arith.truncf %72 : vector<1x32x32xf32> to vector<1x32x32xbf16>
    "tpu.trace_start"() <{level = 10 : i32, message = "bqk,bkd->bqd"}> : () -> ()
    %cst_28 = arith.constant dense<0.000000e+00> : vector<1x32x32xf32>
    %74 = tpu.matmul %73, %57, %cst_28 {dimension_numbers = #tpu.dot_dimension_numbers<[2], [1], [1], [2], [0, 0, 0, 1, 1, 2], [0], [0]>} : vector<1x32x32xbf16>, vector<1x32x32xbf16>, vector<1x32x32xf32> -> vector<1x32x32xf32>
    "tpu.trace_stop"() : () -> ()
    %75 = vector.shape_cast %74 : vector<1x32x32xf32> to vector<32x32xf32>
    %76 = arith.truncf %75 : vector<32x32xf32> to vector<32x32xbf16>
    %77 = vector.extract_strided_slice %47 {offsets = [0, 0], sizes = [32, 128], strides = [1, 1]} : vector<128x128xbf16> to vector<32x128xbf16>
    %cst_29 = arith.constant dense<0.000000e+00> : vector<32x128xf32>
    %78 = tpu.matmul %76, %77, %cst_29 {dimension_numbers = #tpu.dot_dimension_numbers<[1], [0], [0], [1], [0, 0, 1, 1], [], []>} : vector<32x32xbf16>, vector<32x128xbf16>, vector<32x128xf32> -> vector<32x128xf32>
    %79 = arith.addf %48, %78 : vector<32x128xf32>
    %80 = vector.extract_strided_slice %40 {offsets = [0, 32], sizes = [32, 32], strides = [1, 1]} : vector<32x128xf32> to vector<32x32xf32>
    %81 = vector.shape_cast %80 : vector<32x32xf32> to vector<1x32x32xf32>
    %82 = arith.truncf %81 : vector<1x32x32xf32> to vector<1x32x32xbf16>
    %83 = vector.extract_strided_slice %41 {offsets = [0, 32], sizes = [32, 32], strides = [1, 1]} : vector<32x128xf32> to vector<32x32xf32>
    %84 = vector.shape_cast %83 : vector<32x32xf32> to vector<1x32x32xf32>
    %85 = arith.truncf %84 : vector<1x32x32xf32> to vector<1x32x32xbf16>
    %86 = vector.extract_strided_slice %42 {offsets = [0, 32], sizes = [32, 32], strides = [1, 1]} : vector<32x128xf32> to vector<32x32xf32>
    %87 = vector.shape_cast %86 : vector<32x32xf32> to vector<1x32x32xf32>
    %88 = arith.truncf %87 : vector<1x32x32xf32> to vector<1x32x32xbf16>
    "tpu.trace_start"() <{level = 10 : i32, message = "bqd,bkd->bqk"}> : () -> ()
    %cst_30 = arith.constant dense<0.000000e+00> : vector<1x32x32xf32>
    %89 = tpu.matmul %82, %85, %cst_30 {dimension_numbers = #tpu.dot_dimension_numbers<[2], [2], [1], [1], [0, 0, 0, 1, 1, 1], [0], [0]>} : vector<1x32x32xbf16>, vector<1x32x32xbf16>, vector<1x32x32xf32> -> vector<1x32x32xf32>
    %cst_31 = arith.constant -1.000000e+30 : f32
    "tpu.trace_stop"() : () -> ()
    %90 = vector.shape_cast %45 : vector<1x1x32xi1> to vector<1x1x32xi1>
    %91 = vector.broadcast %90 : vector<1x1x32xi1> to vector<1x32x32xi1>
    %92 = vector.broadcast %cst_31 : f32 to vector<1x32x32xf32>
    %93 = arith.select %91, %89, %92 : vector<1x32x32xi1>, vector<1x32x32xf32>
    %cst_32 = arith.constant dense<0xFF800000> : vector<1x32xf32>
    %94 = vector.multi_reduction <maximumf>, %93, %cst_32 [2] : vector<1x32x32xf32> to vector<1x32xf32>
    %95 = vector.shape_cast %94 : vector<1x32xf32> to vector<1x32x1xf32>
    %96 = vector.broadcast %95 : vector<1x32x1xf32> to vector<1x32x32xf32>
    %97 = arith.subf %93, %96 : vector<1x32x32xf32>
    %98 = math.exp %97 : vector<1x32x32xf32>
    %cst_33 = arith.constant dense<0.000000e+00> : vector<1x32xf32>
    %99 = vector.multi_reduction <add>, %98, %cst_33 [2] : vector<1x32x32xf32> to vector<1x32xf32>
    %100 = vector.shape_cast %99 : vector<1x32xf32> to vector<1x32x1xf32>
    %101 = tpu.reciprocal %100 {approx = true} : vector<1x32x1xf32> -> vector<1x32x1xf32>
    %102 = vector.broadcast %101 : vector<1x32x1xf32> to vector<1x32x32xf32>
    %103 = arith.mulf %98, %102 : vector<1x32x32xf32>
    %104 = arith.truncf %103 : vector<1x32x32xf32> to vector<1x32x32xbf16>
    "tpu.trace_start"() <{level = 10 : i32, message = "bqk,bkd->bqd"}> : () -> ()
    %cst_34 = arith.constant dense<0.000000e+00> : vector<1x32x32xf32>
    %105 = tpu.matmul %104, %88, %cst_34 {dimension_numbers = #tpu.dot_dimension_numbers<[2], [1], [1], [2], [0, 0, 0, 1, 1, 2], [0], [0]>} : vector<1x32x32xbf16>, vector<1x32x32xbf16>, vector<1x32x32xf32> -> vector<1x32x32xf32>
    "tpu.trace_stop"() : () -> ()
    %106 = vector.shape_cast %105 : vector<1x32x32xf32> to vector<32x32xf32>
    %107 = arith.truncf %106 : vector<32x32xf32> to vector<32x32xbf16>
    %108 = vector.extract_strided_slice %47 {offsets = [32, 0], sizes = [32, 128], strides = [1, 1]} : vector<128x128xbf16> to vector<32x128xbf16>
    %cst_35 = arith.constant dense<0.000000e+00> : vector<32x128xf32>
    %109 = tpu.matmul %107, %108, %cst_35 {dimension_numbers = #tpu.dot_dimension_numbers<[1], [0], [0], [1], [0, 0, 1, 1], [], []>} : vector<32x32xbf16>, vector<32x128xbf16>, vector<32x128xf32> -> vector<32x128xf32>
    %110 = arith.addf %79, %109 : vector<32x128xf32>
    %111 = vector.extract_strided_slice %40 {offsets = [0, 64], sizes = [32, 32], strides = [1, 1]} : vector<32x128xf32> to vector<32x32xf32>
    %112 = vector.shape_cast %111 : vector<32x32xf32> to vector<1x32x32xf32>
    %113 = arith.truncf %112 : vector<1x32x32xf32> to vector<1x32x32xbf16>
    %114 = vector.extract_strided_slice %41 {offsets = [0, 64], sizes = [32, 32], strides = [1, 1]} : vector<32x128xf32> to vector<32x32xf32>
    %115 = vector.shape_cast %114 : vector<32x32xf32> to vector<1x32x32xf32>
    %116 = arith.truncf %115 : vector<1x32x32xf32> to vector<1x32x32xbf16>
    %117 = vector.extract_strided_slice %42 {offsets = [0, 64], sizes = [32, 32], strides = [1, 1]} : vector<32x128xf32> to vector<32x32xf32>
    %118 = vector.shape_cast %117 : vector<32x32xf32> to vector<1x32x32xf32>
    %119 = arith.truncf %118 : vector<1x32x32xf32> to vector<1x32x32xbf16>
    "tpu.trace_start"() <{level = 10 : i32, message = "bqd,bkd->bqk"}> : () -> ()
    %cst_36 = arith.constant dense<0.000000e+00> : vector<1x32x32xf32>
    %120 = tpu.matmul %113, %116, %cst_36 {dimension_numbers = #tpu.dot_dimension_numbers<[2], [2], [1], [1], [0, 0, 0, 1, 1, 1], [0], [0]>} : vector<1x32x32xbf16>, vector<1x32x32xbf16>, vector<1x32x32xf32> -> vector<1x32x32xf32>
    %cst_37 = arith.constant -1.000000e+30 : f32
    "tpu.trace_stop"() : () -> ()
    %121 = vector.shape_cast %45 : vector<1x1x32xi1> to vector<1x1x32xi1>
    %122 = vector.broadcast %121 : vector<1x1x32xi1> to vector<1x32x32xi1>
    %123 = vector.broadcast %cst_37 : f32 to vector<1x32x32xf32>
    %124 = arith.select %122, %120, %123 : vector<1x32x32xi1>, vector<1x32x32xf32>
    %cst_38 = arith.constant dense<0xFF800000> : vector<1x32xf32>
    %125 = vector.multi_reduction <maximumf>, %124, %cst_38 [2] : vector<1x32x32xf32> to vector<1x32xf32>
    %126 = vector.shape_cast %125 : vector<1x32xf32> to vector<1x32x1xf32>
    %127 = vector.broadcast %126 : vector<1x32x1xf32> to vector<1x32x32xf32>
    %128 = arith.subf %124, %127 : vector<1x32x32xf32>
    %129 = math.exp %128 : vector<1x32x32xf32>
    %cst_39 = arith.constant dense<0.000000e+00> : vector<1x32xf32>
    %130 = vector.multi_reduction <add>, %129, %cst_39 [2] : vector<1x32x32xf32> to vector<1x32xf32>
    %131 = vector.shape_cast %130 : vector<1x32xf32> to vector<1x32x1xf32>
    %132 = tpu.reciprocal %131 {approx = true} : vector<1x32x1xf32> -> vector<1x32x1xf32>
    %133 = vector.broadcast %132 : vector<1x32x1xf32> to vector<1x32x32xf32>
    %134 = arith.mulf %129, %133 : vector<1x32x32xf32>
    %135 = arith.truncf %134 : vector<1x32x32xf32> to vector<1x32x32xbf16>
    "tpu.trace_start"() <{level = 10 : i32, message = "bqk,bkd->bqd"}> : () -> ()
    %cst_40 = arith.constant dense<0.000000e+00> : vector<1x32x32xf32>
    %136 = tpu.matmul %135, %119, %cst_40 {dimension_numbers = #tpu.dot_dimension_numbers<[2], [1], [1], [2], [0, 0, 0, 1, 1, 2], [0], [0]>} : vector<1x32x32xbf16>, vector<1x32x32xbf16>, vector<1x32x32xf32> -> vector<1x32x32xf32>
    "tpu.trace_stop"() : () -> ()
    %137 = vector.shape_cast %136 : vector<1x32x32xf32> to vector<32x32xf32>
    %138 = arith.truncf %137 : vector<32x32xf32> to vector<32x32xbf16>
    %139 = vector.extract_strided_slice %47 {offsets = [64, 0], sizes = [32, 128], strides = [1, 1]} : vector<128x128xbf16> to vector<32x128xbf16>
    %cst_41 = arith.constant dense<0.000000e+00> : vector<32x128xf32>
    %140 = tpu.matmul %138, %139, %cst_41 {dimension_numbers = #tpu.dot_dimension_numbers<[1], [0], [0], [1], [0, 0, 1, 1], [], []>} : vector<32x32xbf16>, vector<32x128xbf16>, vector<32x128xf32> -> vector<32x128xf32>
    %141 = arith.addf %110, %140 : vector<32x128xf32>
    %142 = vector.extract_strided_slice %40 {offsets = [0, 96], sizes = [32, 32], strides = [1, 1]} : vector<32x128xf32> to vector<32x32xf32>
    %143 = vector.shape_cast %142 : vector<32x32xf32> to vector<1x32x32xf32>
    %144 = arith.truncf %143 : vector<1x32x32xf32> to vector<1x32x32xbf16>
    %145 = vector.extract_strided_slice %41 {offsets = [0, 96], sizes = [32, 32], strides = [1, 1]} : vector<32x128xf32> to vector<32x32xf32>
    %146 = vector.shape_cast %145 : vector<32x32xf32> to vector<1x32x32xf32>
    %147 = arith.truncf %146 : vector<1x32x32xf32> to vector<1x32x32xbf16>
    %148 = vector.extract_strided_slice %42 {offsets = [0, 96], sizes = [32, 32], strides = [1, 1]} : vector<32x128xf32> to vector<32x32xf32>
    %149 = vector.shape_cast %148 : vector<32x32xf32> to vector<1x32x32xf32>
    %150 = arith.truncf %149 : vector<1x32x32xf32> to vector<1x32x32xbf16>
    "tpu.trace_start"() <{level = 10 : i32, message = "bqd,bkd->bqk"}> : () -> ()
    %cst_42 = arith.constant dense<0.000000e+00> : vector<1x32x32xf32>
    %151 = tpu.matmul %144, %147, %cst_42 {dimension_numbers = #tpu.dot_dimension_numbers<[2], [2], [1], [1], [0, 0, 0, 1, 1, 1], [0], [0]>} : vector<1x32x32xbf16>, vector<1x32x32xbf16>, vector<1x32x32xf32> -> vector<1x32x32xf32>
    %cst_43 = arith.constant -1.000000e+30 : f32
    "tpu.trace_stop"() : () -> ()
    %152 = vector.shape_cast %45 : vector<1x1x32xi1> to vector<1x1x32xi1>
    %153 = vector.broadcast %152 : vector<1x1x32xi1> to vector<1x32x32xi1>
    %154 = vector.broadcast %cst_43 : f32 to vector<1x32x32xf32>
    %155 = arith.select %153, %151, %154 : vector<1x32x32xi1>, vector<1x32x32xf32>
    %cst_44 = arith.constant dense<0xFF800000> : vector<1x32xf32>
    %156 = vector.multi_reduction <maximumf>, %155, %cst_44 [2] : vector<1x32x32xf32> to vector<1x32xf32>
    %157 = vector.shape_cast %156 : vector<1x32xf32> to vector<1x32x1xf32>
    %158 = vector.broadcast %157 : vector<1x32x1xf32> to vector<1x32x32xf32>
    %159 = arith.subf %155, %158 : vector<1x32x32xf32>
    %160 = math.exp %159 : vector<1x32x32xf32>
    %cst_45 = arith.constant dense<0.000000e+00> : vector<1x32xf32>
    %161 = vector.multi_reduction <add>, %160, %cst_45 [2] : vector<1x32x32xf32> to vector<1x32xf32>
    %162 = vector.shape_cast %161 : vector<1x32xf32> to vector<1x32x1xf32>
    %163 = tpu.reciprocal %162 {approx = true} : vector<1x32x1xf32> -> vector<1x32x1xf32>
    %164 = vector.broadcast %163 : vector<1x32x1xf32> to vector<1x32x32xf32>
    %165 = arith.mulf %160, %164 : vector<1x32x32xf32>
    %166 = arith.truncf %165 : vector<1x32x32xf32> to vector<1x32x32xbf16>
    "tpu.trace_start"() <{level = 10 : i32, message = "bqk,bkd->bqd"}> : () -> ()
    %cst_46 = arith.constant dense<0.000000e+00> : vector<1x32x32xf32>
    %167 = tpu.matmul %166, %150, %cst_46 {dimension_numbers = #tpu.dot_dimension_numbers<[2], [1], [1], [2], [0, 0, 0, 1, 1, 2], [0], [0]>} : vector<1x32x32xbf16>, vector<1x32x32xbf16>, vector<1x32x32xf32> -> vector<1x32x32xf32>
    "tpu.trace_stop"() : () -> ()
    %168 = vector.shape_cast %167 : vector<1x32x32xf32> to vector<32x32xf32>
    %169 = arith.truncf %168 : vector<32x32xf32> to vector<32x32xbf16>
    %170 = vector.extract_strided_slice %47 {offsets = [96, 0], sizes = [32, 128], strides = [1, 1]} : vector<128x128xbf16> to vector<32x128xbf16>
    %cst_47 = arith.constant dense<0.000000e+00> : vector<32x128xf32>
    %171 = tpu.matmul %169, %170, %cst_47 {dimension_numbers = #tpu.dot_dimension_numbers<[1], [0], [0], [1], [0, 0, 1, 1], [], []>} : vector<32x32xbf16>, vector<32x128xbf16>, vector<32x128xf32> -> vector<32x128xf32>
    %172 = arith.addf %141, %171 : vector<32x128xf32>
    %173 = arith.addf %3, %172 : vector<32x128xf32>
    %c0_48 = arith.constant 0 : index
    %c0_49 = arith.constant 0 : index
    %c0_50 = arith.constant 0 : index
    %174 = vector.load %arg10[%c0_48, %c0_49, %c0_50] : memref<1x1x128xf32, #tpu.memory_space<vmem>>, vector<1x1x128xf32>
    %175 = vector.shape_cast %174 : vector<1x1x128xf32> to vector<1x128xf32>
    %176 = vector.broadcast %175 : vector<1x128xf32> to vector<32x128xf32>
    %177 = arith.addf %173, %176 : vector<32x128xf32>
    %c0_51 = arith.constant 0 : index
    %c0_52 = arith.constant 0 : index
    %c0_53 = arith.constant 0 : index
    %178 = vector.load %arg11[%c0_51, %c0_52, %c0_53] : memref<1x1x128xf32, #tpu.memory_space<vmem>>, vector<1x1x128xf32>
    %179 = vector.shape_cast %178 : vector<1x1x128xf32> to vector<1x128xf32>
    %c0_54 = arith.constant 0 : index
    %c0_55 = arith.constant 0 : index
    %c0_56 = arith.constant 0 : index
    %180 = vector.load %arg12[%c0_54, %c0_55, %c0_56] : memref<1x1x128xf32, #tpu.memory_space<vmem>>, vector<1x1x128xf32>
    %181 = vector.shape_cast %180 : vector<1x1x128xf32> to vector<1x128xf32>
    %cst_57 = arith.constant dense<0.000000e+00> : vector<32xf32>
    %182 = vector.multi_reduction <add>, %177, %cst_57 [1] : vector<32x128xf32> to vector<32xf32>
    %183 = vector.shape_cast %182 : vector<32xf32> to vector<32x1xf32>
    %cst_58 = arith.constant 1.280000e+02 : f32
    %184 = vector.broadcast %cst_58 : f32 to vector<32x1xf32>
    %185 = arith.divf %183, %184 : vector<32x1xf32>
    %186 = vector.broadcast %185 : vector<32x1xf32> to vector<32x128xf32>
    %187 = arith.subf %177, %186 : vector<32x128xf32>
    %188 = arith.mulf %187, %187 : vector<32x128xf32>
    %cst_59 = arith.constant dense<0.000000e+00> : vector<32xf32>
    %189 = vector.multi_reduction <add>, %188, %cst_59 [1] : vector<32x128xf32> to vector<32xf32>
    %190 = vector.shape_cast %189 : vector<32xf32> to vector<32x1xf32>
    %cst_60 = arith.constant 1.280000e+02 : f32
    %191 = vector.broadcast %cst_60 : f32 to vector<32x1xf32>
    %192 = arith.divf %190, %191 : vector<32x1xf32>
    %193 = vector.broadcast %185 : vector<32x1xf32> to vector<32x128xf32>
    %194 = arith.subf %177, %193 : vector<32x128xf32>
    %cst_61 = arith.constant 9.99999997E-7 : f32
    %195 = vector.broadcast %cst_61 : f32 to vector<32x1xf32>
    %196 = arith.addf %192, %195 : vector<32x1xf32>
    %197 = math.rsqrt %196 : vector<32x1xf32>
    %198 = vector.broadcast %197 : vector<32x1xf32> to vector<32x128xf32>
    %199 = arith.mulf %194, %198 : vector<32x128xf32>
    %200 = vector.broadcast %179 : vector<1x128xf32> to vector<32x128xf32>
    %201 = arith.mulf %199, %200 : vector<32x128xf32>
    %202 = vector.broadcast %181 : vector<1x128xf32> to vector<32x128xf32>
    %203 = arith.addf %201, %202 : vector<32x128xf32>
    %204 = arith.truncf %203 : vector<32x128xf32> to vector<32x128xbf16>
    %c0_62 = arith.constant 0 : index
    %c0_63 = arith.constant 0 : index
    %c0_64 = arith.constant 0 : index
    %205 = vector.load %arg13[%c0_62, %c0_63, %c0_64] : memref<1x128x512xbf16, #tpu.memory_space<vmem>>, vector<1x128x512xbf16>
    %206 = vector.shape_cast %205 : vector<1x128x512xbf16> to vector<128x512xbf16>
    %cst_65 = arith.constant dense<0.000000e+00> : vector<32x512xf32>
    %207 = tpu.matmul %204, %206, %cst_65 {dimension_numbers = #tpu.dot_dimension_numbers<[1], [0], [0], [1], [0, 0, 1, 1], [], []>} : vector<32x128xbf16>, vector<128x512xbf16>, vector<32x512xf32> -> vector<32x512xf32>
    %c0_66 = arith.constant 0 : index
    %c0_67 = arith.constant 0 : index
    %c0_68 = arith.constant 0 : index
    %208 = vector.load %arg14[%c0_66, %c0_67, %c0_68] : memref<1x1x512xf32, #tpu.memory_space<vmem>>, vector<1x1x512xf32>
    %209 = vector.shape_cast %208 : vector<1x1x512xf32> to vector<1x512xf32>
    %210 = vector.broadcast %209 : vector<1x512xf32> to vector<32x512xf32>
    %211 = arith.addf %207, %210 : vector<32x512xf32>
    %212 = arith.mulf %211, %211 : vector<32x512xf32>
    %213 = arith.mulf %211, %212 : vector<32x512xf32>
    %cst_69 = arith.constant 4.471500e-02 : f32
    %214 = vector.broadcast %cst_69 : f32 to vector<32x512xf32>
    %215 = arith.mulf %214, %213 : vector<32x512xf32>
    %216 = arith.addf %211, %215 : vector<32x512xf32>
    %cst_70 = arith.constant 0.797884583 : f32
    %217 = vector.broadcast %cst_70 : f32 to vector<32x512xf32>
    %218 = arith.mulf %217, %216 : vector<32x512xf32>
    %219 = math.tanh %218 : vector<32x512xf32>
    %cst_71 = arith.constant 1.000000e+00 : f32
    %220 = vector.broadcast %cst_71 : f32 to vector<32x512xf32>
    %221 = arith.addf %220, %219 : vector<32x512xf32>
    %cst_72 = arith.constant 5.000000e-01 : f32
    %222 = vector.broadcast %cst_72 : f32 to vector<32x512xf32>
    %223 = arith.mulf %222, %221 : vector<32x512xf32>
    %224 = arith.mulf %211, %223 : vector<32x512xf32>
    %225 = arith.truncf %224 : vector<32x512xf32> to vector<32x512xbf16>
    %c0_73 = arith.constant 0 : index
    %c0_74 = arith.constant 0 : index
    %c0_75 = arith.constant 0 : index
    %226 = vector.load %arg15[%c0_73, %c0_74, %c0_75] : memref<1x512x128xbf16, #tpu.memory_space<vmem>>, vector<1x512x128xbf16>
    %227 = vector.shape_cast %226 : vector<1x512x128xbf16> to vector<512x128xbf16>
    %cst_76 = arith.constant dense<0.000000e+00> : vector<32x128xf32>
    %228 = tpu.matmul %225, %227, %cst_76 {dimension_numbers = #tpu.dot_dimension_numbers<[1], [0], [0], [1], [0, 0, 1, 1], [], []>} : vector<32x512xbf16>, vector<512x128xbf16>, vector<32x128xf32> -> vector<32x128xf32>
    %c0_77 = arith.constant 0 : index
    %c0_78 = arith.constant 0 : index
    %c0_79 = arith.constant 0 : index
    %229 = vector.load %arg16[%c0_77, %c0_78, %c0_79] : memref<1x1x128xf32, #tpu.memory_space<vmem>>, vector<1x1x128xf32>
    %230 = vector.shape_cast %229 : vector<1x1x128xf32> to vector<1x128xf32>
    %231 = vector.broadcast %230 : vector<1x128xf32> to vector<32x128xf32>
    %232 = arith.addf %228, %231 : vector<32x128xf32>
    %233 = arith.addf %177, %232 : vector<32x128xf32>
    %c0_80 = arith.constant 0 : index
    %c0_81 = arith.constant 0 : index
    %234 = vector.load %arg22[%c0_80, %c0_81] : memref<32x128xf32, #tpu.memory_space<vmem>>, vector<32x128xf32>
    tpu.vector_store %arg22[%c0_80, %c0_81], %233 {strides = array<i32>} : memref<32x128xf32, #tpu.memory_space<vmem>>, vector<32x128xf32>,
    %c1_i32 = arith.constant 1 : i32
    %235 = arith.cmpi eq, %arg1, %c1_i32 : i32
    %236 = arith.extui %235 : i1 to i32
    %c0_i32_82 = arith.constant 0 : i32
    %237 = arith.cmpi ne, %236, %c0_i32_82 : i32
    scf.if %237 {
      %238 = vector.shape_cast %233 : vector<32x128xf32> to vector<1x32x128xf32>
      %239 = vector.extract_strided_slice %238 {offsets = [0, 0, 0], sizes = [1, 1, 128], strides = [1, 1, 1]} : vector<1x32x128xf32> to vector<1x1x128xf32>
      %240 = vector.shape_cast %239 : vector<1x1x128xf32> to vector<1x128xf32>
      %c0_83 = arith.constant 0 : index
      %c0_84 = arith.constant 0 : index
      %241 = vector.load %arg17[%c0_83, %c0_84] : memref<1x128xf32, #tpu.memory_space<vmem>>, vector<1x128xf32>
      %c0_85 = arith.constant 0 : index
      %c0_86 = arith.constant 0 : index
      %242 = vector.load %arg18[%c0_85, %c0_86] : memref<1x128xf32, #tpu.memory_space<vmem>>, vector<1x128xf32>
      %cst_87 = arith.constant dense<0.000000e+00> : vector<1xf32>
      %243 = vector.multi_reduction <add>, %240, %cst_87 [1] : vector<1x128xf32> to vector<1xf32>
      %244 = vector.shape_cast %243 : vector<1xf32> to vector<1x1xf32>
      %cst_88 = arith.constant 1.280000e+02 : f32
      %245 = vector.broadcast %cst_88 : f32 to vector<1x1xf32>
      %246 = arith.divf %244, %245 : vector<1x1xf32>
      %247 = vector.broadcast %246 : vector<1x1xf32> to vector<1x128xf32>
      %248 = arith.subf %240, %247 : vector<1x128xf32>
      %249 = arith.mulf %248, %248 : vector<1x128xf32>
      %cst_89 = arith.constant dense<0.000000e+00> : vector<1xf32>
      %250 = vector.multi_reduction <add>, %249, %cst_89 [1] : vector<1x128xf32> to vector<1xf32>
      %251 = vector.shape_cast %250 : vector<1xf32> to vector<1x1xf32>
      %cst_90 = arith.constant 1.280000e+02 : f32
      %252 = vector.broadcast %cst_90 : f32 to vector<1x1xf32>
      %253 = arith.divf %251, %252 : vector<1x1xf32>
      %254 = vector.broadcast %246 : vector<1x1xf32> to vector<1x128xf32>
      %255 = arith.subf %240, %254 : vector<1x128xf32>
      %cst_91 = arith.constant 9.99999997E-7 : f32
      %256 = vector.broadcast %cst_91 : f32 to vector<1x1xf32>
      %257 = arith.addf %253, %256 : vector<1x1xf32>
      %258 = math.rsqrt %257 : vector<1x1xf32>
      %259 = vector.broadcast %258 : vector<1x1xf32> to vector<1x128xf32>
      %260 = arith.mulf %255, %259 : vector<1x128xf32>
      %261 = arith.mulf %260, %241 : vector<1x128xf32>
      %262 = arith.addf %261, %242 : vector<1x128xf32>
      %263 = arith.truncf %262 : vector<1x128xf32> to vector<1x128xbf16>
      %c0_92 = arith.constant 0 : index
      %c0_93 = arith.constant 0 : index
      %264 = vector.load %arg19[%c0_92, %c0_93] : memref<128x128xbf16, #tpu.memory_space<vmem>>, vector<128x128xbf16>
      %cst_94 = arith.constant dense<0.000000e+00> : vector<1x128xf32>
      %265 = tpu.matmul %263, %264, %cst_94 {dimension_numbers = #tpu.dot_dimension_numbers<[1], [0], [0], [1], [0, 0, 1, 1], [], []>} : vector<1x128xbf16>, vector<128x128xbf16>, vector<1x128xf32> -> vector<1x128xf32>
      %c0_95 = arith.constant 0 : index
      %c0_96 = arith.constant 0 : index
      %266 = vector.load %arg20[%c0_95, %c0_96] : memref<1x128xf32, #tpu.memory_space<vmem>>, vector<1x128xf32>
      %267 = arith.addf %265, %266 : vector<1x128xf32>
      %c0_97 = arith.constant 0 : index
      %c0_98 = arith.constant 0 : index
      %c0_99 = arith.constant 0 : index
      %268 = vector.load %arg21[%c0_97, %c0_98, %c0_99] : memref<1x1x128xf32, #tpu.memory_space<vmem>>, vector<1x1x128xf32>
      %269 = vector.shape_cast %268 : vector<1x1x128xf32> to vector<1x128xf32>
      %270 = vector.shape_cast %267 : vector<1x128xf32> to vector<1x1x128xf32>
      tpu.vector_store %arg21[%c0_97, %c0_98, %c0_99], %270 {strides = array<i32>} : memref<1x1x128xf32, #tpu.memory_space<vmem>>, vector<1x1x128xf32>,
    } else {
    }
    return
  }
  func.func @transform_0(%arg0: i32, %arg1: i32) -> (i32, i32, i32) {
    %c0_i32 = arith.constant 0 : i32
    %c0_i32_0 = arith.constant 0 : i32
    %c0_i32_1 = arith.constant 0 : i32
    return %arg0, %c0_i32, %c0_i32_0 : i32, i32, i32
  }
  func.func @transform_1(%arg0: i32, %arg1: i32) -> (i32, i32) {
    %c0_i32 = arith.constant 0 : i32
    %c0_i32_0 = arith.constant 0 : i32
    %c0_i32_1 = arith.constant 0 : i32
    return %c0_i32, %c0_i32_0 : i32, i32
  }
  func.func @transform_2(%arg0: i32, %arg1: i32) -> (i32, i32, i32) {
    %c0_i32 = arith.constant 0 : i32
    %c0_i32_0 = arith.constant 0 : i32
    %c0_i32_1 = arith.constant 0 : i32
    %c0_i32_2 = arith.constant 0 : i32
    return %c0_i32, %c0_i32_0, %c0_i32_1 : i32, i32, i32
  }
  func.func @transform_3(%arg0: i32, %arg1: i32) -> (i32, i32, i32) {
    %c0_i32 = arith.constant 0 : i32
    %c0_i32_0 = arith.constant 0 : i32
    %c0_i32_1 = arith.constant 0 : i32
    return %arg1, %c0_i32, %c0_i32_0 : i32, i32, i32
  }
  func.func @transform_4(%arg0: i32, %arg1: i32) -> (i32, i32, i32) {
    %c0_i32 = arith.constant 0 : i32
    %c0_i32_0 = arith.constant 0 : i32
    %c0_i32_1 = arith.constant 0 : i32
    return %arg1, %c0_i32, %c0_i32_0 : i32, i32, i32
  }
  func.func @transform_5(%arg0: i32, %arg1: i32) -> (i32, i32, i32) {
    %c0_i32 = arith.constant 0 : i32
    %c0_i32_0 = arith.constant 0 : i32
    %c0_i32_1 = arith.constant 0 : i32
    return %arg1, %c0_i32, %c0_i32_0 : i32, i32, i32
  }
  func.func @transform_6(%arg0: i32, %arg1: i32) -> (i32, i32, i32) {
    %c0_i32 = arith.constant 0 : i32
    %c0_i32_0 = arith.constant 0 : i32
    %c0_i32_1 = arith.constant 0 : i32
    return %arg1, %c0_i32, %c0_i32_0 : i32, i32, i32
  }
  func.func @transform_7(%arg0: i32, %arg1: i32) -> (i32, i32, i32) {
    %c0_i32 = arith.constant 0 : i32
    %c0_i32_0 = arith.constant 0 : i32
    %c0_i32_1 = arith.constant 0 : i32
    return %arg1, %c0_i32, %c0_i32_0 : i32, i32, i32
  }
  func.func @transform_8(%arg0: i32, %arg1: i32) -> (i32, i32, i32) {
    %c0_i32 = arith.constant 0 : i32
    %c0_i32_0 = arith.constant 0 : i32
    %c0_i32_1 = arith.constant 0 : i32
    return %arg1, %c0_i32, %c0_i32_0 : i32, i32, i32
  }
  func.func @transform_9(%arg0: i32, %arg1: i32) -> (i32, i32, i32) {
    %c0_i32 = arith.constant 0 : i32
    %c0_i32_0 = arith.constant 0 : i32
    %c0_i32_1 = arith.constant 0 : i32
    return %arg1, %c0_i32, %c0_i32_0 : i32, i32, i32
  }
  func.func @transform_10(%arg0: i32, %arg1: i32) -> (i32, i32, i32) {
    %c0_i32 = arith.constant 0 : i32
    %c0_i32_0 = arith.constant 0 : i32
    %c0_i32_1 = arith.constant 0 : i32
    return %arg1, %c0_i32, %c0_i32_0 : i32, i32, i32
  }
  func.func @transform_11(%arg0: i32, %arg1: i32) -> (i32, i32, i32) {
    %c0_i32 = arith.constant 0 : i32
    %c0_i32_0 = arith.constant 0 : i32
    %c0_i32_1 = arith.constant 0 : i32
    return %arg1, %c0_i32, %c0_i32_0 : i32, i32, i32
  }
  func.func @transform_12(%arg0: i32, %arg1: i32) -> (i32, i32, i32) {
    %c0_i32 = arith.constant 0 : i32
    %c0_i32_0 = arith.constant 0 : i32
    %c0_i32_1 = arith.constant 0 : i32
    return %arg1, %c0_i32, %c0_i32_0 : i32, i32, i32
  }
  func.func @transform_13(%arg0: i32, %arg1: i32) -> (i32, i32, i32) {
    %c0_i32 = arith.constant 0 : i32
    %c0_i32_0 = arith.constant 0 : i32
    %c0_i32_1 = arith.constant 0 : i32
    return %arg1, %c0_i32, %c0_i32_0 : i32, i32, i32
  }
  func.func @transform_14(%arg0: i32, %arg1: i32) -> (i32, i32, i32) {
    %c0_i32 = arith.constant 0 : i32
    %c0_i32_0 = arith.constant 0 : i32
    %c0_i32_1 = arith.constant 0 : i32
    return %arg1, %c0_i32, %c0_i32_0 : i32, i32, i32
  }
  func.func @transform_15(%arg0: i32, %arg1: i32) -> (i32, i32) {
    %c0_i32 = arith.constant 0 : i32
    %c0_i32_0 = arith.constant 0 : i32
    %c0_i32_1 = arith.constant 0 : i32
    return %c0_i32, %c0_i32_0 : i32, i32
  }
  func.func @transform_16(%arg0: i32, %arg1: i32) -> (i32, i32) {
    %c0_i32 = arith.constant 0 : i32
    %c0_i32_0 = arith.constant 0 : i32
    %c0_i32_1 = arith.constant 0 : i32
    return %c0_i32, %c0_i32_0 : i32, i32
  }
  func.func @transform_17(%arg0: i32, %arg1: i32) -> (i32, i32) {
    %c0_i32 = arith.constant 0 : i32
    %c0_i32_0 = arith.constant 0 : i32
    %c0_i32_1 = arith.constant 0 : i32
    return %c0_i32, %c0_i32_0 : i32, i32
  }
  func.func @transform_18(%arg0: i32, %arg1: i32) -> (i32, i32) {
    %c0_i32 = arith.constant 0 : i32
    %c0_i32_0 = arith.constant 0 : i32
    %c0_i32_1 = arith.constant 0 : i32
    return %c0_i32, %c0_i32_0 : i32, i32
  }
  func.func @transform_19(%arg0: i32, %arg1: i32) -> (i32, i32, i32) {
    %c0_i32 = arith.constant 0 : i32
    %c0_i32_0 = arith.constant 0 : i32
    %c0_i32_1 = arith.constant 0 : i32
    return %arg0, %c0_i32, %c0_i32_0 : i32, i32, i32
  }
}

</mosaic_0001>

<bundles_post_ra>
// kernel: vit_forward.1
= control target key start
LH: loop header
LB: loop body
LE: loop exit
PB: predicated region body
PF: predicated region fallthrough
CT: control target
= control target key end

     0   :  { %s5329_s0 = inlined_call_operand.vmem [shape: f32[2,32,48], index: 0, kind: input, shape index: {}]   ;;  %s5330_s1 = inlined_call_operand.vmem [shape: bf16[48,128], index: 1, kind: input, shape index: {}]   ;;  %s5331_s2 = inlined_call_operand.vmem [shape: f32[1,32,128], index: 2, kind: input, shape index: {}]   ;;  %s5332_s3 = inlined_call_operand.vmem [shape: f32[2,1,128], index: 3, kind: input, shape index: {}]   ;;  %s5333_s4 = inlined_call_operand.vmem [shape: f32[2,1,128], index: 4, kind: input, shape index: {}]   ;;  %s5334_s5 = inlined_call_operand.vmem [shape: bf16[2,128,384], index: 5, kind: input, shape index: {}]   ;;  %s5335_s6 = inlined_call_operand.vmem [shape: f32[2,1,384], index: 6, kind: input, shape index: {}]   ;;  %s5336_s7 = inlined_call_operand.vmem [shape: bf16[2,128,128], index: 7, kind: input, shape index: {}]   ;;  %s5337_s8 = inlined_call_operand.vmem [shape: f32[2,1,128], index: 8, kind: input, shape index: {}]   ;;  %s5338_s9 = inlined_call_operand.vmem [shape: f32[2,1,128], index: 9, kind: input, shape index: {}]   ;;  %s5339_s10 = inlined_call_operand.vmem [shape: f32[2,1,128], index: 10, kind: input, shape index: {}]   ;;  %s5340_s11 = inlined_call_operand.vmem [shape: bf16[2,128,512], index: 11, kind: input, shape index: {}]   ;;  %s5341_s12 = inlined_call_operand.vmem [shape: f32[2,1,512], index: 12, kind: input, shape index: {}]   ;;  %s5342_s13 = inlined_call_operand.vmem [shape: bf16[2,512,128], index: 13, kind: input, shape index: {}]   ;;  %s5343_s14 = inlined_call_operand.vmem [shape: f32[2,1,128], index: 14, kind: input, shape index: {}]   ;;  %s5344_s15 = inlined_call_operand.vmem [shape: f32[1,128], index: 15, kind: input, shape index: {}]   ;;  %s5345_s16 = inlined_call_operand.vmem [shape: f32[1,128], index: 16, kind: input, shape index: {}]   ;;  %s5346_s17 = inlined_call_operand.vmem [shape: bf16[128,128], index: 17, kind: input, shape index: {}]   ;;  %s5347_s18 = inlined_call_operand.vmem [shape: f32[1,128], index: 18, kind: input, shape index: {}]   ;;  %s5348_s19 = inlined_call_operand.hbm [shape: f32[2,1,128], index: 19, kind: output, shape index: {}]  }
   0x1   :  { %5365 = sst [smem:[#allocation18_spill]] %s5329_s0 }
   0x2   :  { %5366 = sst [smem:[#allocation19_spill]] %s5330_s1 }
   0x3   :  { %5367 = sst [smem:[#allocation20_spill]] %s5331_s2 }
   0x4   :  { %5368 = sst [smem:[#allocation21_spill]] %s5332_s3 }
   0x5   :  { %5369 = sst [smem:[#allocation22_spill]] %s5334_s5 }
   0x6   :  { %5370 = sst [smem:[#allocation23_spill]] %s5335_s6 }
   0x7   :  { %5371 = sst [smem:[#allocation24_spill]] %s5336_s7 }
   0x8   :  { %5372 = sst [smem:[#allocation25_spill]] %s5344_s15 }
   0x9   :  { %5373 = sst [smem:[#allocation26_spill]] %s5345_s16 }
   0xa   :  { %5374 = sst [smem:[#allocation27_spill]] %s5346_s17 }
   0xb   :  { %5375 = sst [smem:[#allocation28_spill]] %s5347_s18 }
   0xc   :  { %5376 = sst [smem:[#allocation29_spill]] %s5348_s19 }
   0xd   :  { %24 = vsyncpa [#allocation4], 0 }
   0xe   :  { %26 = vsyncpa [#allocation4 + $0x1], 0  ;;  %s4539_s0 = smov 0   ;;  %s4541_s30 = smov 0  }
   0xf   :  { %s4543_s20 = smov 0   ;;  %s4545_s21 = smov 0  }
  0x10   :  { %s4547_s1 = smov 0   ;;  %s4549_s22 = smov 0  }
  0x11   :  { %s4551_s2 = smov 0   ;;  %s4553_s23 = smov 0  }
  0x12 LB: > { %5377 = sst [smem:[#allocation6_spill]] %s4402_s0  ;;  %s3551_s24 = sadd.s32 4294967295, %s4430_s23   ;;  %s4430_s23 = sphi %s4553_s23, %s32_s23   ;;  %s4426_s2 = sphi %s4551_s2, %s5424_s2   ;;  %s4422_s22 = sphi %s4549_s22, %s5423_s22   ;;  %s4418_s1 = sphi %s4547_s1, %s5422_s1   ;;  %s4414_s21 = sphi %s4545_s21, %s5421_s21   ;;  %s4410_s20 = sphi %s4543_s20, %s5420_s20   ;;  %s4406_s30 = sphi %s4541_s30, %s5426_s30   ;;  %s4402_s0 = sphi %s4539_s0, %s5425_s0  }
  0x13   : > { %5378 = sst [smem:[#allocation7_spill]] %s4410_s20  ;;  %s3552_s25 = sadd.s32 4294967294, %s4430_s23  }
  0x14   : > { %5379 = sst [smem:[#allocation8_spill]] %s4414_s21  ;;  %s41_s3 = sadd.s32 1, %s4422_s22 }
  0x15   : > { %5380 = sst [smem:[#allocation9_spill]] %s4418_s1  ;;  %p42_p0 = scmp.ge.s32.totalorder %s41_s3, 2 }
  0x16   : > { %5381 = sst [smem:[#allocation10_spill]] %s4422_s22  ;;  %s44_s26 = sadd.s32 1, %s4426_s2 }
  0x17   : > { %5382 = sst [smem:[#allocation11_spill]] %s4426_s2  ;;  %p525_p1 = scmp.ne.s32.totalorder %s4410_s20, %s4406_s30 }
  0x18   : > { %5383 = sst [smem:[#allocation12_spill]] %s4430_s23  ;;  %p526_p2 = scmp.eq.s32.totalorder %s3551_s24, 3 }
  0x19   : > { %s5428_s3 = smov (%p42_p0, %s41_s3), 0  ;;  %s5430_s26 = smov (!%p42_p0, %s44_s26), %s4426_s2 }
  0x1a   : > { %5384 = sst [smem:[#allocation13_spill]] %s5428_s3  ;;  %p4588_p3 = por %p526_p2, %p525_p1 }
  0x1b   : > { %p531_p4 = scmp.ne.s32.totalorder %s4406_s30, %s4402_s0  ;;  %p46_p5 = scmp.ge.s32.totalorder %s5430_s26, 2 }
  0x1c   : > { %s5385_s27 = scalar_select %p4588_p3, 1, 0 }
  0x1d   : > { %p532_p6 = scmp.eq.s32.totalorder %s3552_s25, 3  ;;  %p3555_p7 = scmp.ge.s32.totalorder %s4430_s23, 1 }
  0x1e   : > { %5386 = sst [smem:[#allocation14_spill]] %s5385_s27  ;;  %p658_p8 = scmp.lt.s32.totalorder %s4430_s23, 5 }
  0x1f   : > { %s5432_s26 = smov (%p46_p5, %s5430_s26), 0  ;;  %p4598_p9 = por %p532_p6, %p531_p4 }
  0x20   : > { %5387 = sst [smem:[#allocation15_spill]] %s5432_s26  ;;  %p659_p10 = pnand %p3555_p7, %p658_p8 }
  0x21   : > { %s5388_s28 = scalar_select %p4598_p9, 1, 0 }
  0x22   : > { %s512_s29 = ssub.s32 %s4426_s2, %s5432_s26  ;;  %s515_s24 = sadd.s32 1, %s4410_s20 }
  0x23   : > { %5389 = sst [smem:[#allocation16_spill]] %s5388_s28  ;;  %p513_p11 = scmp.eq.s32.totalorder %s512_s29, 0 }
  0x24   : > { %662 = sbr.rel (%p659_p10) target bundleno = 4515 (0x11a3), region = 96  ;;  %p759_p12 = scmp.lt.s32.totalorder (!%p659_p10), %s4418_s1, 1 }
  0x25   : > { %s4606_s3 = scalar_select %p513_p11, %s4410_s20, %s515_s24  }
  0x26   : > { %p764_p13 = scmp.lt.s32.totalorder (!%p659_p10), %s4414_s21, 1  ;;  %s5391_s2 = sld [smem:[#allocation18_spill]] (!%p659_p10) }
  0x27   : > { %5390 = sst [smem:[#allocation17_spill]] %s4606_s3  ;;  %s5393_s5 = sld [smem:[#allocation22_spill]] (!%p659_p10) }
  0x28   : > { %s5394_s7 = sld [smem:[#allocation24_spill]] (!%p659_p10)  ;;  %s5395_s6 = sld [smem:[#allocation23_spill]] (!%p659_p10) }
  0x2b   : > { %s760_s22 = scalar_select %p759_p12, %s4418_s1, 1 }
  0x2c   : > { %s4613_s0 = scalar_select %p764_p13, %s4414_s21, 1 }
  0x2d   : > { %s3710_s29 = sshll.u32 %s760_s22, 5 }
  0x2e   : > { %s4618_s25 = scalar_lea.vmem %s5391_s2, %s3710_s29  ;;  %s4008_s18 = smul.u32 192, %s4613_s0 }
  0x2f   : > { %s4009_s16 = smul.u32 3, %s4613_s0  ;;  %s3711_s15 = sshll.u32 %s4613_s0, 6 }
  0x30   : > { %s4634_s21 = scalar_lea.vmem %s5393_s5, %s4008_s18  ;;  %s4639_s29 = scalar_lea.vmem %s5394_s7, %s3711_s15 }
  0x31   : > { %s4644_s19 = scalar_lea.vmem %s5395_s6, %s4009_s16  ;;  %s3712_s2 = sshll.u32 %s4613_s0, 8 }
  0x32   : > { %s3563_s15 = sshll.u32 %s4613_s0, 2  ;;  %s4663_s20 = scalar_lea.vmem %s5340_s11, %s3712_s2 }
  0x33   : > { %s4668_s27 = scalar_lea.vmem %s5341_s12, %s3563_s15  ;;  %s4673_s1 = scalar_lea.vmem %s5342_s13, %s3712_s2 }
  0x34   : > { %s809_s22 = scalar_lea.vmem %s5343_s14, %s4613_s0  ;;  %s5396_s5 = sand.u32 1, %s4406_s30  }
  0x35   : > { %s4681_s17 = scalar_lea.vmem [#allocation3], %s5396_s5  ;;  %s5397_s7 = sld [smem:[#allocation8_spill]] }
  0x3b   : > { %p3566_p0 = scmp.ne.s32.totalorder %s5397_s7, 0 }
  0x3c   : > { %s5398_s16 = sld [smem:[#allocation19_spill]] (!%p3566_p0)  ;;  %v815_v2 = vld [vmem:[%s4618_s25] sm:$0xff] (!%p3566_p0)  ;;  %v816_v3 = vld [vmem:[%s4618_s25 + $0x8] sm:$0xff] (!%p3566_p0)  ;;  %vm845_vm0 = vcmask (!%p3566_p0), 392192   ;;  %v817_v6 = vld [vmem:[%s4618_s25 + $0x10] sm:$0xff] (!%p3566_p0)  ;;  %s5399_s28 = sld [smem:[#allocation20_spill]] (!%p3566_p0) }
  0x3d   : > { %814 = sbr.rel (%p3566_p0) target bundleno = 297 (0x129), region = 100  ;;  %v819_v5 = vpack.c.bf16 (!%p3566_p0), %v816_v3, %v815_v2  ;;  %v818_v7 = vld [vmem:[%s4618_s25 + $0x18] sm:$0xff] (!%p3566_p0) }
  0x3e   : > { %v820_v8 = vpack.c.bf16 (!%p3566_p0), %v818_v7, %v817_v6 }
  0x3f   : > { %3848 = vmatprep.mubr.msk.bf16.mxu0 (!%p3566_p0), %vm845_vm0, %v819_v5 }
  0x42   : > { %v4087_v0 = vld [vmem:[%s5398_s16] sm:$0xff] (!%p3566_p0)   ;;  %v4088_v1 = vld [vmem:[%s5398_s16 + $0x8] sm:$0xff] (!%p3566_p0)   ;;  %v4089_v4 = vld [vmem:[%s5398_s16 + $0x10] sm:$0xff] (!%p3566_p0)  }
  0x43   : > { %3842 = vmatprep.subr.bf16.mxu0 (!%p3566_p0), %v4087_v0  ;;  %v903_v9 = vld [vmem:[%s5399_s28 + $0x10] sm:$0xff] (!%p3566_p0)  ;;  %v901_v10 = vld [vmem:[%s5399_s28] sm:$0xff] (!%p3566_p0)  ;;  %v904_v12 = vld [vmem:[%s5399_s28 + $0x18] sm:$0xff] (!%p3566_p0) }
  0x44   : > { %3843 = vmatpush3.bf16.msra.mxu0 %v4087_v0  ;;  %v902_v15 = vld [vmem:[%s5399_s28 + $0x8] sm:$0xff] }
  0x45   : > { %3844 = vmatprep.subr.bf16.mxu0 %v4088_v1 }
  0x48   : > { %3845 = vmatpush3.bf16.msra.mxu0 %v4088_v1 }
  0x49   : > { %3846 = vmatprep.subr.bf16.mxu0 %v4089_v4 }
  0x4c   : > { %3847 = vmatpush3.bf16.msra.mxu0 %v4089_v4 }
  0x4f   : > { %3849 = vmatmul.mubr.msk.bf16.vlgmr.msra.gmra.mrb[0].mxu0 %vm845_vm0, %v820_v8 }
 0x122   : > { %v3850_v11 = vpop.f32.mrb[0].mxu0 }
 0x123   : > { %v907_v13 = vadd.f32 %v3850_v11, %v903_v9  ;;  %v886_v14 = vpop.f32.mrb[1].mxu0 }
 0x124   : > { %v905_v16 = vadd.f32 %v901_v10, %v886_v14  ;;  %v3851_v17 = vpop.f32.mrb[2].mxu0 }
 0x125   : > { %911 = vst [vmem:[#allocation2 + $0x10] sm:$0xff] %v907_v13  ;;  %v908_v18 = vadd.f32 %v3851_v17, %v904_v12  ;;  %v889_v19 = vpop.f32.mrb[3].mxu0 }
 0x126   : > { %909 = vst [vmem:[#allocation2] sm:$0xff] %v905_v16  ;;  %v906_v20 = vadd.f32 %v902_v15, %v889_v19 }
 0x127   : > { %912 = vst [vmem:[#allocation2 + $0x18] sm:$0xff] %v908_v18 }
 0x128   : > { %910 = vst [vmem:[#allocation2 + $0x8] sm:$0xff] %v906_v20 }
 0x129 PF: > { %v4090_v25 = vld [vmem:[%s4634_s21 + $0x4] ss:$12 sps:$4 sm:$0xff]   ;;  %v4092_v26 = vld [vmem:[%s4634_s21] ss:$12 sps:$4 sm:$0xff]   ;;  %v4093_v27 = vld [vmem:[%s4634_s21 + $0x1c] ss:$12 sps:$4 sm:$0xff]   ;;  %s5402_s23 = scalar_lea.vmem %s5333_s4, %s4613_s0  ;;  %s5403_s24 = scalar_lea.vmem %s5337_s8, %s4613_s0 }
 0x12a   : > { %v4095_v28 = vld [vmem:[%s4634_s21 + $0x8] ss:$12 sps:$4 sm:$0xff]   ;;  %1163 = vmatprep.subr.bf16.mxu0 %v4090_v25  ;;  %v4096_v45 = vld [vmem:[%s4634_s21 + $0x18] ss:$12 sps:$4 sm:$0xff]   ;;  %v4099_v47 = vld [vmem:[%s4634_s21 + $0x20] ss:$12 sps:$4 sm:$0xff]  }
 0x12b   : > { %1164 = vmatpush1.bf16.msra.mxu0 %v4092_v26  ;;  %3852 = vmatprep.subr.bf16.mxu1 %v4095_v28  ;;  %v4097_v46 = vld [vmem:[%s4634_s21 + $0x34] ss:$12 sps:$4 sm:$0xff]   ;;  %v4100_v48 = vld [vmem:[%s4634_s21 + $0x30] ss:$12 sps:$4 sm:$0xff]   ;;  %v4101_v49 = vld [vmem:[%s4634_s21 + $0x4c] ss:$12 sps:$4 sm:$0xff]  }
 0x12c   : > { %v915_v22 = vld [vmem:[#allocation2 + $0x10] sm:$0xff]  ;;  %1165 = vmatprep.subr.bf16.mxu0 %v4093_v27  ;;  %3853 = vmatpush3.bf16.msra.mxu1 %v4095_v28  ;;  %v4103_v50 = vld [vmem:[%s4634_s21 + $0x38] ss:$12 sps:$4 sm:$0xff]   ;;  %v4108_v54 = vld [vmem:[%s4634_s21 + $0x60] ss:$12 sps:$4 sm:$0xff]   ;;  %v4432_v60 = vmov 0  }
 0x12d   : > { %v913_v21 = vld [vmem:[#allocation2] sm:$0xff]  ;;  %923 = vadd.xlane.f32.xlu1 %v915_v22  ;;  %3854 = vmatprep.subr.bf16.mxu1 %v4099_v47  ;;  %v4104_v51 = vld [vmem:[%s4634_s21 + $0x48] ss:$12 sps:$4 sm:$0xff]   ;;  %v4107_v53 = vld [vmem:[%s4634_s21 + $0x50] ss:$12 sps:$4 sm:$0xff]   ;;  %s5400_s5 = sld [smem:[#allocation21_spill]] }
 0x12e   : > { %919 = vadd.xlane.f32.xlu0 %v913_v21  ;;  %v916_v24 = vld [vmem:[#allocation2 + $0x18] sm:$0xff]  ;;  %v4105_v52 = vld [vmem:[%s4634_s21 + $0x64] ss:$12 sps:$4 sm:$0xff]   ;;  %v4111_v56 = vld [vmem:[%s4634_s21 + $0x68] ss:$12 sps:$4 sm:$0xff]   ;;  %1195 = vmatprep.mubr.bf16.mxu0 %v4432_v60  ;;  %vm1294_vm1 = vcmask 261120  }
 0x12f   : > { %v914_v23 = vld [vmem:[#allocation2 + $0x8] sm:$0xff]  ;;  %1166 = vmatpush1.bf16.msra.mxu0 %v4096_v45  ;;  %v4112_v57 = vld [vmem:[%s4634_s21 + $0x78] ss:$12 sps:$4 sm:$0xff]   ;;  %v4113_v58 = vld [vmem:[%s4634_s21 + $0x94] ss:$12 sps:$4 sm:$0xff]   ;;  %s4434_s18 = smov 64  }
 0x130   : > { %1167 = vmatprep.subr.bf16.mxu0 %v4097_v46  ;;  %3855 = vmatpush3.bf16.msra.mxu1 %v4099_v47  ;;  %v4109_v55 = vld [vmem:[%s4634_s21 + $0x7c] ss:$12 sps:$4 sm:$0xff]   ;;  %v4115_v59 = vld [vmem:[%s4634_s21 + $0x80] ss:$12 sps:$4 sm:$0xff]   ;;  %v4119_v63 = vld [vmem:[%s4634_s21 + $0x98] ss:$12 sps:$4 sm:$0xff]  }
 0x131   : > { %925 = vadd.xlane.f32.xlu1 %v916_v24  ;;  %3856 = vmatprep.subr.bf16.mxu1 %v4103_v50  ;;  %v4116_v61 = vld [vmem:[%s4634_s21 + $0x90] ss:$12 sps:$4 sm:$0xff]   ;;  %v4117_v62 = vld [vmem:[%s4634_s21 + $0xac] ss:$12 sps:$4 sm:$0xff]   ;;  %v4120_v0 = vld [vmem:[%s4634_s21 + $0xa8] ss:$12 sps:$4 sm:$0xff]  }
 0x132   : > { %921 = vadd.xlane.f32.xlu0 %v914_v23  ;;  %v4121_v1 = vld [vmem:[%s4634_s21 + $0xb0] ss:$12 sps:$4 sm:$0xff]   ;;  %s4435_s7 = smov 32   ;;  %s5404_s21 = scalar_lea.vmem %s5338_s9, %s4613_s0 }
 0x133   : > { %1168 = vmatpush1.bf16.msra.mxu0 %v4100_v48  ;;  %s5401_s15 = scalar_lea.vmem %s5400_s5, %s4613_s0 }
 0x134   : > { %1169 = vmatprep.subr.bf16.mxu0 %v4101_v49  ;;  %3857 = vmatpush3.bf16.msra.mxu1 %v4103_v50  ;;  %v3572_v16 = vld [vmem:[%s5401_s15] ss:$0 sm:$0xff]  ;;  %s5405_s15 = scalar_lea.vmem %s5339_s10, %s4613_s0  ;;  %s5406_s0 = sld [smem:[#allocation8_spill]] }
 0x135   : > { %3858 = vmatprep.subr.bf16.mxu1 %v4107_v53 }
 0x137   : > { %1170 = vmatpush1.bf16.msra.mxu0 %v4104_v51 }
 0x138   : > { %1171 = vmatprep.subr.bf16.mxu0 %v4105_v52  ;;  %3859 = vmatpush3.bf16.msra.mxu1 %v4107_v53 }
 0x139   : > { %3860 = vmatprep.subr.bf16.mxu1 %v4111_v56 }
 0x13a   : > { %p3698_p1 = scmp.ne.s32.totalorder %s5406_s0, 1 }
 0x13b   : > { %1172 = vmatpush1.bf16.msra.mxu0 %v4108_v54  ;;  %vm3223_vm3 = vcmask (!%p3698_p1), 1040384   ;;  %s5407_s3 = sld [smem:[#allocation27_spill]] (!%p3698_p1)  ;;  %vm4437_vm4 = vmmov (!%p3698_p1), 0   ;;  %s5410_s26 = sld [smem:[#allocation28_spill]] (!%p3698_p1) }
 0x13c   : > { %1173 = vmatprep.subr.bf16.mxu0 %v4109_v55  ;;  %3861 = vmatpush3.bf16.msra.mxu1 %v4111_v56 }
 0x13d   : > { %3862 = vmatprep.subr.bf16.mxu1 %v4115_v59 }
 0x13f   : > { %1174 = vmatpush1.bf16.msra.mxu0 %v4112_v57 }
 0x140   : > { %1175 = vmatprep.subr.bf16.mxu0 %v4113_v58  ;;  %3863 = vmatpush3.bf16.msra.mxu1 %v4115_v59 }
 0x141   : > { %3864 = vmatprep.subr.bf16.mxu1 %v4119_v63 }
 0x143   : > { %1176 = vmatpush1.bf16.msra.mxu0 %v4116_v61 }
 0x144   : > { %1177 = vmatprep.subr.bf16.mxu0 %v4117_v62  ;;  %3865 = vmatpush3.bf16.msra.mxu1 %v4119_v63 }
 0x145   : > { %3866 = vmatprep.subr.bf16.mxu1 %v4121_v1 }
 0x147   : > { %1178 = vmatpush1.bf16.msra.mxu0 %v4120_v0 }
 0x148   : > { %3867 = vmatpush3.bf16.msra.mxu1 %v4121_v1 }
 0x1ba   : > { %v924_v30 = vpop.xlane.xlu1 %923 }
 0x1bb   : > { %v920_v29 = vpop.xlane.xlu0 %919  ;;  %v930_v32 = vmul.f32 0.0078125, %v924_v30 }
 0x1bc   : > { %v928_v31 = vmul.f32 0.0078125, %v920_v29 }
 0x1bd   : > { %v4715_v34 = vsub.f32 %v915_v22, %v930_v32 }
 0x1be   : > { %v4713_v33 = vsub.f32 %v913_v21, %v928_v31  ;;  %v926_v36 = vpop.xlane.xlu1 %925  ;;  %v3573_v21 = vld [vmem:[%s5402_s23] ss:$0 sm:$0xff] }
 0x1bf   : > { %v922_v35 = vpop.xlane.xlu0 %921  ;;  %v931_v39 = vmul.f32 0.0078125, %v926_v36  ;;  %v938_v42 = vmul.f32 %v4715_v34, %v4715_v34 }
 0x1c0   : > { %v929_v37 = vmul.f32 0.0078125, %v922_v35  ;;  %v936_v38 = vmul.f32 %v4713_v33, %v4713_v33 }
 0x1c1   : > { %v4721_v41 = vsub.f32 %v916_v24, %v931_v39 }
 0x1c2   : > { %v4719_v40 = vsub.f32 %v914_v23, %v929_v37  ;;  %940 = vadd.xlane.f32.xlu0 %v936_v38  ;;  %v1018_v37 = vld [vmem:[%s4644_s19] sm:$0x7]  ;;  %s4433_s19 = smov 96  }
 0x1c3   : > { %v939_v44 = vmul.f32 %v4721_v41, %v4721_v41 }
 0x1c4   : > { %v937_v43 = vmul.f32 %v4719_v40, %v4719_v40 }
 0x1c6   : > { %944 = vadd.xlane.f32.xlu0 %v938_v42  ;;  %942 = vadd.xlane.f32.xlu1 %v937_v43 }
 0x1ca   : > { %946 = vadd.xlane.f32.xlu1 %v939_v44 }
 0x24f   : > { %v941_v2 = vpop.xlane.xlu0 %940 }
 0x250   : > { %v948_v3 = vmul.f32 0.0078125, %v941_v2 }
 0x252   : > { %v952_v4 = vadd.f32 1e-06, %v948_v3 }
 0x253   : > { %v943_v5 = vpop.xlane.xlu1 %942  ;;  %v945_v6 = vpop.xlane.xlu0 %944 }
 0x254   : > { %4210 = vrsqrt.f32 %v952_v4  ;;  %v949_v7 = vmul.f32 0.0078125, %v943_v5  ;;  %v950_v8 = vmul.f32 0.0078125, %v945_v6 }
 0x256   : > { %v953_v9 = vadd.f32 1e-06, %v949_v7  ;;  %v954_v10 = vadd.f32 1e-06, %v950_v8 }
 0x257   : > { %v947_v11 = vpop.xlane.xlu1 %946 }
 0x258   : > { %4212 = vrsqrt.f32 %v953_v9  ;;  %v951_v12 = vmul.f32 0.0078125, %v947_v11 }
 0x259   : > { %4214 = vrsqrt.f32 %v954_v10 }
 0x25a   : > { %v955_v13 = vadd.f32 1e-06, %v951_v12 }
 0x25c   : > { %4216 = vrsqrt.f32 %v955_v13 }
 0x25e   : > { %v4211_v14 = vpop.eup %4210 }
 0x25f   : > { %v960_v15 = vmul.f32 %v4211_v14, %v4713_v33 }
 0x261   : > { %v970_v20 = vmul.f32 %v3572_v16, %v960_v15 }
 0x262   : > { %v4213_v17 = vpop.eup %4212 }
 0x263   : > { %v4215_v18 = vpop.eup %4214  ;;  %v961_v19 = vmul.f32 %v4213_v17, %v4719_v40  ;;  %v980_v25 = vadd.f32 %v3573_v21, %v970_v20 }
 0x264   : > { %v962_v22 = vmul.f32 %v4215_v18, %v4715_v34  ;;  %v1020_v34 = vlaneseq }
 0x265   : > { %v971_v23 = vmul.f32 %v3572_v16, %v961_v19 }
 0x266   : > { %v4217_v24 = vpop.eup %4216  ;;  %v972_v28 = vmul.f32 %v3572_v16, %v962_v22  ;;  %v4765_v35 = vshrl.u32 %v1020_v34, 7 }
 0x267   : > { %v981_v26 = vadd.f32 %v3573_v21, %v971_v23  ;;  %v963_v27 = vmul.f32 %v4217_v24, %v4721_v41 }
 0x268   : > { %v982_v31 = vadd.f32 %v3573_v21, %v972_v28  ;;  %v1022_v36 = vsub.s32 0, %v4765_v35  ;;  %v1026_v38 = vsub.s32 1, %v4765_v35  ;;  %v1030_v40 = vsub.s32 2, %v4765_v35 }
 0x269   : > { %v984_v29 = vpack.c.bf16 %v981_v26, %v980_v25  ;;  %v973_v30 = vmul.f32 %v3572_v16, %v963_v27  ;;  %v4805_v16 = vand.u32 127, %v1020_v34 }
 0x26a   : > { %v1023_v39 = vrot.slane %v1018_v37, %v1022_v36  ;;  %v1027_v42 = vrot.slane %v1018_v37, %v1026_v38  ;;  %v1031_v48 = vrot.slane %v1018_v37, %v1030_v40 }
 0x26b   : > { %1196 = vmatmul.mubr.bf16.vlgmr.msra.gmra.mrb[0].mxu0 %v984_v29  ;;  %3868 = vmatprep.mubr.bf16.mxu1 %v984_v29  ;;  %v983_v32 = vadd.f32 %v3573_v21, %v973_v30  ;;  %vm1271_vm2 = vcmp.lt.s32.totalorder %v4805_v16, 17 }
 0x26c   : > { %1205 = vmatprep.mubr.bf16.mxu0 %v4432_v60 }
 0x26d   : > { %v985_v33 = vpack.c.bf16 %v983_v32, %v982_v31 }
 0x26f   : > { %3869 = vmatmul.mubr.bf16.vlgmr.msra.gmra.mrb[0].mxu1 %v985_v33 }
 0x273   : > { %1206 = vmatmul.mubr.bf16.gmra.mrb[4].mxu0 %v985_v33 }
 0x33e   : > { %v1197_v41 = vpop.f32.mrb[0].mxu0 }
 0x33f   : > { %v1198_v43 = vadd.f32 %v1197_v41, %v1023_v39  ;;  %v1199_v44 = vpop.f32.mrb[1].mxu0 }
 0x340   : > { %v1201_v45 = vpop.f32.mrb[2].mxu0  ;;  %v1200_v49 = vadd.f32 %v1199_v44, %v1027_v42 }
 0x341   : > { %v1202_v46 = vadd.f32 %v1201_v45, %v1023_v39  ;;  %v1203_v47 = vpop.f32.mrb[3].mxu0  ;;  %v1265_v52 = vmul.f32 0.17677669, %v1198_v43 }
 0x342   : > { %v1204_v50 = vadd.f32 %v1203_v47, %v1027_v42  ;;  %v3870_v51 = vpop.f32.mrb[0].mxu1 }
 0x343   : > { %v1266_v53 = vmul.f32 0.17677669, %v1202_v46  ;;  %v1250_v54 = vpop.f32.mrb[1].mxu1  ;;  %v1259_v58 = vadd.f32 %v3870_v51, %v1031_v48 }
 0x344   : > { %v4777_v55 = vpack.c.bf16 %v1204_v50, %v1200_v49  ;;  %v3871_v56 = vpop.f32.mrb[2].mxu1  ;;  %v1251_v62 = vadd.f32 %v1250_v54, %v1031_v48 }
 0x345   : > { %v4779_v57 = vpack.c.bf16 %v1266_v53, %v1265_v52  ;;  %v1262_v59 = vadd.f32 %v3871_v56, %v1031_v48  ;;  %v1253_v61 = vpop.f32.mrb[3].mxu1 }
 0x346   : > { %v1254_v63 = vadd.f32 %v1253_v61, %v1031_v48  ;;  %v1207_v0 = vpop.f32.mrb[4].mxu0  ;;  %4000 = vmatprep.subr.msk.bf16.mxu0 %vm1294_vm1, %v4777_v55  ;;  %v1302_v1 = vsel %vm1294_vm1, %v4777_v55, 0 }
 0x347   : > { %v4785_v2 = vpack.c.bf16 %v1262_v59, %v1259_v58  ;;  %v1208_v3 = vadd.f32 %v1207_v0, %v1023_v39  ;;  %v1209_v4 = vpop.f32.mrb[5].mxu0  ;;  %3873 = vmatpush3.bf16.xpose.msra.mxu0 %v1302_v1  ;;  %3876 = vmatprep.mubr.msk.bf16.mxu0 %vm1294_vm1, %v4779_v57 }
 0x348   : > { %v4789_v5 = vpack.c.bf16 %v1254_v63, %v1251_v62  ;;  %v1211_v6 = vpop.f32.mrb[6].mxu0  ;;  %v1210_v9 = vadd.f32 %v1209_v4, %v1027_v42 }
 0x349   : > { %v1212_v7 = vadd.f32 %v1211_v6, %v1023_v39  ;;  %v1213_v8 = vpop.f32.mrb[7].mxu0  ;;  %v1267_v11 = vmul.f32 0.17677669, %v1208_v3 }
 0x34a   : > { %v1214_v10 = vadd.f32 %v1213_v8, %v1027_v42  ;;  %3880 = vmatprep.subr.bf16.mxu1 %v4789_v5 }
 0x34b   : > { %v1268_v12 = vmul.f32 0.17677669, %v1212_v7  ;;  %3881 = vmatpush3.bf16.msra.mxu1 %v4789_v5 }
 0x34c   : > { %v4793_v13 = vpack.c.bf16 %v1214_v10, %v1210_v9  ;;  %3882 = vmatprep.subr.bf16.mxu1 %v4785_v2 }
 0x34d   : > { %v4796_v14 = vpack.c.bf16 %v1268_v12, %v1267_v11 }
 0x34e   : > { %4001 = vmatprep.subr.msk.bf16.mxu0 %vm1294_vm1, %v4793_v13  ;;  %v1305_v15 = vsel %vm1294_vm1, %v4793_v13, 0 }
 0x34f   : > { %3875 = vmatpush3.bf16.xpose.msra.mxu0 %v1305_v15  ;;  %3883 = vmatpush3.bf16.msra.mxu1 %v4785_v2 }
 0x356   : > { %3877 = vmatmul.mubr.msk.bf16.vlgmr.msra.gmra.mrb[8].mxu0 %vm1294_vm1, %v4796_v14 }
 0x429   : > { %v3878_v17 = vpop.f32.mrb[8].mxu0 }
 0x42a   : > { %v1341_v18 = vpop.f32.mrb[9].mxu0  ;;  %v1360_v23 = vsel %vm1271_vm2, %v3878_v17, -1e+30 }
 0x42b   : > { %v1358_v19 = vsel %vm1271_vm2, %v1341_v18, -1e+30  ;;  %v3879_v20 = vpop.f32.mrb[10].mxu0  ;;  %v1368_v27 = vsel %vm1294_vm1, %v1360_v23, -inf }
 0x42c   : > { %v1344_v21 = vpop.f32.mrb[11].mxu0  ;;  %v1362_v22 = vsel %vm1294_vm1, %v1358_v19, -inf  ;;  %v1361_v26 = vsel %vm1271_vm2, %v3879_v20, -1e+30 }
 0x42d   : > { %v1359_v24 = vsel %vm1271_vm2, %v1344_v21, -1e+30  ;;  %1363 = vmax.xlane.f32.xlu0 %v1362_v22  ;;  %v1371_v28 = vsel %vm1294_vm1, %v1361_v26, -inf }
 0x42e   : > { %v1365_v25 = vsel %vm1294_vm1, %v1359_v24, -inf }
 0x42f   : > { %1366 = vmax.xlane.f32.xlu1 %v1365_v25 }
 0x431   : > { %1369 = vmax.xlane.f32.xlu0 %v1368_v27 }
 0x433   : > { %1372 = vmax.xlane.f32.xlu1 %v1371_v28 }
 0x4ba   : > { %v1364_v29 = vpop.xlane.xlu0 %1363 }
 0x4bb   : > { %v1374_v30 = vsub.f32 %v1358_v19, %v1364_v29 }
 0x4bc   : > { %v1367_v31 = vpop.xlane.xlu1 %1366 }
 0x4bd   : > { %v1375_v32 = vsub.f32 %v1359_v24, %v1367_v31  ;;  %v1378_v39 = vmul.f32 1.442695, %v1374_v30 }
 0x4be   : > { %v1370_v33 = vpop.xlane.xlu0 %1369 }
 0x4bf   : > { %v1380_v34 = vmul.f32 1.442695, %v1375_v32  ;;  %v1376_v37 = vsub.f32 %v1360_v23, %v1370_v33 }
 0x4c0   : > { %v1373_v41 = vpop.xlane.xlu1 %1372 }
 0x4c1   : > { %4218 = vpow2.f32 %v1380_v34  ;;  %v1382_v42 = vmul.f32 1.442695, %v1376_v37  ;;  %v1377_v43 = vsub.f32 %v1361_v26, %v1373_v41 }
 0x4c3   : > { %4220 = vpow2.f32 %v1382_v42  ;;  %v1384_v44 = vmul.f32 1.442695, %v1377_v43 }
 0x4c4   : > { %4222 = vpow2.f32 %v1378_v39 }
 0x4c5   : > { %4224 = vpow2.f32 %v1384_v44 }
 0x4cb   : > { %v4219_v45 = vpop.eup %4218 }
 0x4cc   : > { %v1389_v46 = vsel %vm1294_vm1, %v4219_v45, 0.0 }
 0x4cd   : > { %v4221_v47 = vpop.eup %4220  ;;  %1390 = vadd.xlane.f32.xlu1 %v1389_v46 }
 0x4ce   : > { %v4223_v48 = vpop.eup %4222  ;;  %v1392_v49 = vsel %vm1294_vm1, %v4221_v47, 0.0 }
 0x4cf   : > { %v4225_v50 = vpop.eup %4224  ;;  %1393 = vadd.xlane.f32.xlu0 %v1392_v49  ;;  %v1386_v52 = vsel %vm1294_vm1, %v4223_v48, 0.0 }
 0x4d0   : > { %v1395_v51 = vsel %vm1294_vm1, %v4225_v50, 0.0 }
 0x4d1   : > { %1396 = vadd.xlane.f32.xlu1 %v1395_v51 }
 0x4d3   : > { %1387 = vadd.xlane.f32.xlu0 %v1386_v52 }
 0x4e2   : > { %1475 = vrot.lane.b32.xlu1 %v4793_v13, %s4433_s19 }
 0x4e6   : > { %1467 = vrot.lane.b32.xlu1 %v4779_v57, %s4433_s19 }
 0x4e9   : > { %1473 = vrot.lane.b32.xlu0 %v4777_v55, %s4433_s19 }
 0x4ea   : > { %1469 = vrot.lane.b32.xlu1 %v4796_v14, %s4433_s19 }
 0x55a   : > { %v1391_v53 = vpop.xlane.xlu1 %1390 }
 0x55b   : > { %4226 = vrcp.f32 %v1391_v53 }
 0x55c   : > { %v1394_v54 = vpop.xlane.xlu0 %1393 }
 0x55e   : > { %v1397_v56 = vpop.xlane.xlu1 %1396 }
 0x55f   : > { %4228 = vrcp.f32 %v1397_v56 }
 0x560   : > { %4230 = vrcp.f32 %v1394_v54  ;;  %v1388_v58 = vpop.xlane.xlu0 %1387 }
 0x561   : > { %4232 = vrcp.f32 %v1388_v58 }
 0x562   : > { %v1476_v3 = vpop.permute.xlu1 %1475 }
 0x563   : > { %v1487_v12 = vsel %vm1294_vm1, %v1476_v3, 0 }
 0x564   : > { %v1474_v59 = vpop.permute.xlu0 %1473 }
 0x565   : > { %4002 = vmatprep.subr.msk.bf16.mxu1 %vm1294_vm1, %v1474_v59  ;;  %v4227_v61 = vpop.eup %4226  ;;  %v1484_v10 = vsel %vm1294_vm1, %v1474_v59, 0 }
 0x566   : > { %v1403_v6 = vmul.f32 %v4227_v61, %v4219_v45  ;;  %v1468_v11 = vpop.permute.xlu1 %1467 }
 0x569   : > { %v4229_v62 = vpop.eup %4228 }
 0x56a   : > { %v4231_v63 = vpop.eup %4230  ;;  %v1405_v1 = vmul.f32 %v4229_v62, %v4225_v50  ;;  %v1470_v15 = vpop.permute.xlu1 %1469  ;;  %v4122_v62 = vld [vmem:[%s4639_s29 + $0x10] sm:$0xff]  }
 0x56b   : > { %v4233_v0 = vpop.eup %4232  ;;  %v1404_v7 = vmul.f32 %v4231_v63, %v4221_v47  ;;  %3904 = vmatprep.subr.bf16.mxu0 %v4122_v62 }
 0x56c   : > { %v1402_v4 = vmul.f32 %v4233_v0, %v4223_v48  ;;  %3905 = vmatpush3.bf16.msra.mxu0 %v4122_v62 }
 0x56d   : > { %v1407_v9 = vpack.c.bf16 %v1405_v1, %v1404_v7 }
 0x56e   : > { %v1406_v8 = vpack.c.bf16 %v1403_v6, %v1402_v4 }
 0x570   : > { %3884 = vmatprep.mubr.msk.bf16.mxu1 %vm1294_vm1, %v1406_v8 }
 0x571   : > { %3885 = vmatmul.mubr.msk.bf16.vlgmr.msra.gmra.mrb[4].mxu1 %vm1294_vm1, %v1407_v9 }
 0x572   : > { %3889 = vmatpush3.bf16.xpose.msra.mxu1 %v1484_v10  ;;  %3892 = vmatprep.mubr.msk.bf16.mxu1 %vm1294_vm1, %v1468_v11 }
 0x573   : > { %4003 = vmatprep.subr.msk.bf16.mxu1 %vm1294_vm1, %v1476_v3 }
 0x57a   : > { %3891 = vmatpush3.bf16.xpose.msra.mxu1 %v1487_v12 }
 0x581   : > { %3893 = vmatmul.mubr.msk.bf16.vlgmr.msra.gmra.mrb[8].mxu1 %vm1294_vm1, %v1470_v15 }
 0x644   : > { %v4840_v17 = vpop.f32.mrb[4].mxu1 }
 0x645   : > { %v4842_v18 = vpop.f32.mrb[5].mxu1 }
 0x646   : > { %v4844_v19 = vpop.f32.mrb[6].mxu1 }
 0x647   : > { %v1464_v20 = vpack.c.bf16 %v4844_v19, %v4840_v17  ;;  %v4848_v21 = vpop.f32.mrb[7].mxu1 }
 0x648   : > { %v1463_v22 = vpack.c.bf16 %v4848_v21, %v4842_v18 }
 0x654   : > { %v3894_v23 = vpop.f32.mrb[8].mxu1 }
 0x655   : > { %v1523_v24 = vpop.f32.mrb[9].mxu1  ;;  %v1540_v29 = vsel %vm1271_vm2, %v3894_v23, -1e+30 }
 0x656   : > { %v1538_v25 = vsel %vm1271_vm2, %v1523_v24, -1e+30  ;;  %v3895_v26 = vpop.f32.mrb[10].mxu1  ;;  %v1548_v32 = vsel %vm1294_vm1, %v1540_v29, -inf }
 0x657   : > { %v1526_v27 = vpop.f32.mrb[11].mxu1  ;;  %v1542_v28 = vsel %vm1294_vm1, %v1538_v25, -inf  ;;  %v1541_v33 = vsel %vm1271_vm2, %v3895_v26, -1e+30 }
 0x658   : > { %v1539_v30 = vsel %vm1271_vm2, %v1526_v27, -1e+30  ;;  %1543 = vmax.xlane.f32.xlu0 %v1542_v28  ;;  %v1551_v34 = vsel %vm1294_vm1, %v1541_v33, -inf }
 0x659   : > { %v1545_v31 = vsel %vm1294_vm1, %v1539_v30, -inf }
 0x65a   : > { %1546 = vmax.xlane.f32.xlu1 %v1545_v31 }
 0x65c   : > { %1549 = vmax.xlane.f32.xlu0 %v1548_v32 }
 0x660   : > { %1552 = vmax.xlane.f32.xlu0 %v1551_v34  ;;  %v4123_v34 = vld [vmem:[%s4639_s29 + $0x18] sm:$0xff]  }
 0x661   : > { %3906 = vmatprep.subr.bf16.mxu0 %v4123_v34 }
 0x662   : > { %3907 = vmatpush3.bf16.msra.mxu0 %v4123_v34 }
 0x66b   : > { %1592 = vrot.lane.b32.xlu1 %v4785_v2, %s4433_s19 }
 0x6e5   : > { %v1544_v37 = vpop.xlane.xlu0 %1543 }
 0x6e6   : > { %v1554_v39 = vsub.f32 %v1538_v25, %v1544_v37  ;;  %v4124_v37 = vld [vmem:[%s4639_s29] sm:$0xff]  }
 0x6e7   : > { %v1547_v41 = vpop.xlane.xlu1 %1546  ;;  %3912 = vmatprep.subr.bf16.mxu0 %v4124_v37 }
 0x6e8   : > { %v1558_v44 = vmul.f32 1.442695, %v1554_v39  ;;  %v1555_v45 = vsub.f32 %v1539_v30, %v1547_v41 }
 0x6e9   : > { %v1550_v42 = vpop.xlane.xlu0 %1549 }
 0x6ea   : > { %v1556_v43 = vsub.f32 %v1540_v29, %v1550_v42  ;;  %v1560_v49 = vmul.f32 1.442695, %v1555_v45 }
 0x6eb   : > { %v1593_v63 = vpop.permute.xlu1 %1592 }
 0x6ec   : > { %v1562_v46 = vmul.f32 1.442695, %v1556_v43 }
 0x6ed   : > { %v1553_v47 = vpop.xlane.xlu0 %1552 }
 0x6ee   : > { %4234 = vpow2.f32 %v1562_v46  ;;  %v1557_v48 = vsub.f32 %v1541_v33, %v1553_v47  ;;  %v4125_v46 = vld [vmem:[%s4639_s29 + $0x8] sm:$0xff]  }
 0x6ef   : > { %4236 = vpow2.f32 %v1558_v44 }
 0x6f0   : > { %v1564_v50 = vmul.f32 1.442695, %v1557_v48 }
 0x6f2   : > { %4238 = vpow2.f32 %v1564_v50 }
 0x6f3   : > { %4240 = vpow2.f32 %v1560_v49 }
 0x6f8   : > { %v4235_v51 = vpop.eup %4234 }
 0x6f9   : > { %v1572_v52 = vsel %vm1294_vm1, %v4235_v51, 0.0  ;;  %v4237_v53 = vpop.eup %4236 }
 0x6fa   : > { %1573 = vadd.xlane.f32.xlu0 %v1572_v52  ;;  %v1566_v56 = vsel %vm1294_vm1, %v4237_v53, 0.0 }
 0x6fc   : > { %v4239_v54 = vpop.eup %4238 }
 0x6fd   : > { %v1575_v58 = vsel %vm1294_vm1, %v4239_v54, 0.0  ;;  %v4241_v59 = vpop.eup %4240 }
 0x6fe   : > { %1567 = vadd.xlane.f32.xlu0 %v1566_v56  ;;  %1576 = vadd.xlane.f32.xlu1 %v1575_v58  ;;  %v1569_v61 = vsel %vm1294_vm1, %v4241_v59, 0.0 }
 0x702   : > { %1570 = vadd.xlane.f32.xlu1 %v1569_v61 }
 0x713   : > { %1791 = vrot.lane.b32.xlu1 %v4777_v55, %s4434_s18 }
 0x714   : > { %1590 = vrot.lane.b32.xlu0 %v4789_v5, %s4433_s19  ;;  %s5409_s19 = sld [smem:[#allocation26_spill]] (!%p3698_p1) }
 0x717   : > { %1793 = vrot.lane.b32.xlu1 %v4793_v13, %s4434_s18 }
 0x718   : > { %1787 = vrot.lane.b32.xlu0 %v4779_v57, %s4434_s18 }
 0x71b   : > { %1789 = vrot.lane.b32.xlu1 %v4796_v14, %s4434_s18 }
 0x71c   : > { %2044 = vrot.lane.b32.xlu0 %v4777_v55, %s4435_s7 }
 0x71f   : > { %2046 = vrot.lane.b32.xlu1 %v4793_v13, %s4435_s7 }
 0x720   : > { %2040 = vrot.lane.b32.xlu0 %v4779_v57, %s4435_s7 }
 0x723   : > { %2042 = vrot.lane.b32.xlu1 %v4796_v14, %s4435_s7 }
 0x787   : > { %v1574_v0 = vpop.xlane.xlu0 %1573 }
 0x78b   : > { %v1568_v1 = vpop.xlane.xlu0 %1567  ;;  %v1577_v3 = vpop.xlane.xlu1 %1576 }
 0x78c   : > { %4242 = vrcp.f32 %v1577_v3 }
 0x78d   : > { %4244 = vrcp.f32 %v1568_v1 }
 0x78e   : > { %4246 = vrcp.f32 %v1574_v0 }
 0x78f   : > { %v1591_v55 = vpop.permute.xlu0 %1590  ;;  %v1571_v4 = vpop.xlane.xlu1 %1570 }
 0x790   : > { %4248 = vrcp.f32 %v1571_v4  ;;  %3896 = vmatprep.subr.bf16.mxu1 %v1591_v55 }
 0x791   : > { %3897 = vmatpush3.bf16.msra.mxu1 %v1591_v55 }
 0x792   : > { %3898 = vmatprep.subr.bf16.mxu1 %v1593_v63 }
 0x793   : > { %v1792_v57 = vpop.permute.xlu1 %1791  ;;  %v1788_v23 = vpop.permute.xlu0 %1787 }
 0x794   : > { %v1802_v24 = vsel %vm1294_vm1, %v1792_v57, 0 }
 0x795   : > { %3899 = vmatpush3.bf16.msra.mxu1 %v1593_v63 }
 0x796   : > { %4004 = vmatprep.subr.msk.bf16.mxu1 %vm1294_vm1, %v1792_v57  ;;  %v4243_v13 = vpop.eup %4242 }
 0x797   : > { %v4245_v14 = vpop.eup %4244  ;;  %v1585_v8 = vmul.f32 %v4243_v13, %v4239_v54  ;;  %v1794_v25 = vpop.permute.xlu1 %1793 }
 0x798   : > { %v4247_v6 = vpop.eup %4246  ;;  %v1582_v9 = vmul.f32 %v4245_v14, %v4237_v53  ;;  %v1805_v26 = vsel %vm1294_vm1, %v1794_v25, 0  ;;  %v2045_v27 = vpop.permute.xlu0 %2044 }
 0x799   : > { %v1584_v11 = vmul.f32 %v4247_v6, %v4235_v51  ;;  %v2055_v29 = vsel %vm1294_vm1, %v2045_v27, 0 }
 0x79a   : > { %v4249_v7 = vpop.eup %4248 }
 0x79b   : > { %v1583_v10 = vmul.f32 %v4249_v7, %v4241_v59  ;;  %v1587_v15 = vpack.c.bf16 %v1585_v8, %v1584_v11  ;;  %v1790_v28 = vpop.permute.xlu1 %1789 }
 0x79c   : > { %v2041_v30 = vpop.permute.xlu0 %2040 }
 0x79d   : > { %v1586_v12 = vpack.c.bf16 %v1583_v10, %v1582_v9 }
 0x79f   : > { %3900 = vmatprep.mubr.msk.bf16.mxu1 %vm1294_vm1, %v1586_v12  ;;  %v2047_v31 = vpop.permute.xlu1 %2046 }
 0x7a0   : > { %3901 = vmatmul.mubr.msk.bf16.vlgmr.msra.gmra.mrb[12].mxu1 %vm1294_vm1, %v1587_v15  ;;  %v2058_v32 = vsel %vm1294_vm1, %v2047_v31, 0 }
 0x7a1   : > { %3921 = vmatpush3.bf16.xpose.msra.mxu1 %v1802_v24  ;;  %3924 = vmatprep.mubr.msk.bf16.mxu1 %vm1294_vm1, %v1788_v23 }
 0x7a2   : > { %4005 = vmatprep.subr.msk.bf16.mxu1 %vm1294_vm1, %v1794_v25 }
 0x7a3   : > { %v2043_v33 = vpop.permute.xlu1 %2042 }
 0x7a9   : > { %3923 = vmatpush3.bf16.xpose.msra.mxu1 %v1805_v26 }
 0x7aa   : > { %4006 = vmatprep.subr.msk.bf16.mxu1 %vm1294_vm1, %v2045_v27 }
 0x7b0   : > { %3925 = vmatmul.mubr.msk.bf16.vlgmr.msra.gmra.mrb[16].mxu1 %vm1294_vm1, %v1790_v28 }
 0x7b1   : > { %3945 = vmatpush3.bf16.xpose.msra.mxu1 %v2055_v29  ;;  %3948 = vmatprep.mubr.msk.bf16.mxu1 %vm1294_vm1, %v2041_v30 }
 0x7b2   : > { %4007 = vmatprep.subr.msk.bf16.mxu1 %vm1294_vm1, %v2047_v31 }
 0x7b9   : > { %3947 = vmatpush3.bf16.xpose.msra.mxu1 %v2058_v32 }
 0x7c0   : > { %3949 = vmatmul.mubr.msk.bf16.vlgmr.msra.gmra.mrb[20].mxu1 %vm1294_vm1, %v2043_v33 }
 0x7c1   : > { %2622 = vmatprep.mubr.bf16.mxu1 %v4432_v60 }
 0x873   : > { %v3902_v39 = vpop.f32.mrb[12].mxu1 }
 0x874   : > { %v1636_v41 = vpop.f32.mrb[13].mxu1 }
 0x875   : > { %v3903_v42 = vpop.f32.mrb[14].mxu1 }
 0x876   : > { %v1652_v43 = vpack.c.bf16 %v3903_v42, %v3902_v39  ;;  %v1639_v44 = vpop.f32.mrb[15].mxu1 }
 0x877   : > { %v1651_v45 = vpack.c.bf16 %v1639_v44, %v1636_v41 }
 0x879   : > { %3908 = vmatprep.mubr.msk.bf16.mxu0 %vm1294_vm1, %v1651_v45 }
 0x87a   : > { %3909 = vmatmul.mubr.msk.bf16.vlgmr.msra.gmra.mrb[12].mxu0 %vm1294_vm1, %v1652_v43 }
 0x87b   : > { %3916 = vmatprep.mubr.msk.bf16.mxu0 %vm1294_vm1, %v1463_v22  ;;  %3913 = vmatpush3.bf16.msra.mxu0 %v4124_v37 }
 0x87c   : > { %3914 = vmatprep.subr.bf16.mxu0 %v4125_v46 }
 0x87f   : > { %3915 = vmatpush3.bf16.msra.mxu0 %v4125_v46 }
 0x883   : > { %v3926_v47 = vpop.f32.mrb[16].mxu1 }
 0x884   : > { %v1841_v48 = vpop.f32.mrb[17].mxu1  ;;  %v1858_v18 = vsel %vm1271_vm2, %v3926_v47, -1e+30 }
 0x885   : > { %v1856_v49 = vsel %vm1271_vm2, %v1841_v48, -1e+30  ;;  %v3927_v50 = vpop.f32.mrb[18].mxu1  ;;  %v1866_v53 = vsel %vm1294_vm1, %v1858_v18, -inf }
 0x886   : > { %v1844_v51 = vpop.f32.mrb[19].mxu1  ;;  %3917 = vmatmul.mubr.msk.bf16.vlgmr.msra.gmra.mrb[12].mxu0 %vm1294_vm1, %v1464_v20  ;;  %v1860_v52 = vsel %vm1294_vm1, %v1856_v49, -inf  ;;  %v1859_v54 = vsel %vm1271_vm2, %v3927_v50, -1e+30 }
 0x887   : > { %v1857_v21 = vsel %vm1271_vm2, %v1844_v51, -1e+30  ;;  %1861 = vmax.xlane.f32.xlu0 %v1860_v52  ;;  %v1869_v17 = vsel %vm1294_vm1, %v1859_v54, -inf }
 0x888   : > { %v1863_v22 = vsel %vm1294_vm1, %v1857_v21, -inf }
 0x889   : > { %1864 = vmax.xlane.f32.xlu1 %v1863_v22 }
 0x88b   : > { %1867 = vmax.xlane.f32.xlu0 %v1866_v53 }
 0x88f   : > { %1870 = vmax.xlane.f32.xlu0 %v1869_v17 }
 0x893   : > { %v3950_v19 = vpop.f32.mrb[20].mxu1 }
 0x894   : > { %v2094_v20 = vpop.f32.mrb[21].mxu1  ;;  %v2111_v25 = vsel %vm1271_vm2, %v3950_v19, -1e+30 }
 0x895   : > { %v3951_v56 = vpop.f32.mrb[22].mxu1  ;;  %v2109_v26 = vsel %vm1271_vm2, %v2094_v20, -1e+30  ;;  %v2119_v27 = vsel %vm1294_vm1, %v2111_v25, -inf }
 0x896   : > { %v2097_v58 = vpop.f32.mrb[23].mxu1  ;;  %v2113_v28 = vsel %vm1294_vm1, %v2109_v26, -inf  ;;  %v2112_v29 = vsel %vm1271_vm2, %v3951_v56, -1e+30 }
 0x897   : > { %v2110_v23 = vsel %vm1271_vm2, %v2097_v58, -1e+30  ;;  %v2122_v30 = vsel %vm1294_vm1, %v2112_v29, -inf }
 0x898   : > { %v2116_v24 = vsel %vm1294_vm1, %v2110_v23, -inf }
 0x914   : > { %v1862_v59 = vpop.xlane.xlu0 %1861 }
 0x915   : > { %v1872_v61 = vsub.f32 %v1856_v49, %v1862_v59 }
 0x916   : > { %v1865_v62 = vpop.xlane.xlu1 %1864 }
 0x917   : > { %v1876_v1 = vmul.f32 1.442695, %v1872_v61  ;;  %v1873_v3 = vsub.f32 %v1857_v21, %v1865_v62 }
 0x918   : > { %v1868_v63 = vpop.xlane.xlu0 %1867 }
 0x919   : > { %v1874_v0 = vsub.f32 %v1858_v18, %v1868_v63  ;;  %v1878_v13 = vmul.f32 1.442695, %v1873_v3 }
 0x91b   : > { %v1880_v55 = vmul.f32 1.442695, %v1874_v0 }
 0x91c   : > { %v1871_v4 = vpop.xlane.xlu0 %1870 }
 0x91d   : > { %4250 = vpow2.f32 %v1880_v55  ;;  %v1875_v57 = vsub.f32 %v1859_v54, %v1871_v4  ;;  %v4126_v55 = vld [vmem:[%s4639_s29 + $0x20] sm:$0xff]   ;;  %v4127_v4 = vld [vmem:[%s4639_s29 + $0x28] sm:$0xff]  }
 0x91e   : > { %4252 = vpow2.f32 %v1876_v1 }
 0x91f   : > { %v1882_v14 = vmul.f32 1.442695, %v1875_v57 }
 0x921   : > { %4254 = vpow2.f32 %v1882_v14 }
 0x922   : > { %4256 = vpow2.f32 %v1878_v13 }
 0x927   : > { %v4251_v6 = vpop.eup %4250 }
 0x928   : > { %v1890_v7 = vsel %vm1294_vm1, %v4251_v6, 0.0  ;;  %v4253_v8 = vpop.eup %4252 }
 0x929   : > { %1891 = vadd.xlane.f32.xlu0 %v1890_v7  ;;  %v1884_v10 = vsel %vm1294_vm1, %v4253_v8, 0.0 }
 0x92b   : > { %v4255_v9 = vpop.eup %4254 }
 0x92c   : > { %v1893_v11 = vsel %vm1294_vm1, %v4255_v9, 0.0  ;;  %v4257_v12 = vpop.eup %4256 }
 0x92d   : > { %1885 = vadd.xlane.f32.xlu0 %v1884_v10  ;;  %1894 = vadd.xlane.f32.xlu1 %v1893_v11  ;;  %v1887_v15 = vsel %vm1294_vm1, %v4257_v12, 0.0 }
 0x931   : > { %1888 = vadd.xlane.f32.xlu1 %v1887_v15 }
 0x942   : > { %1908 = vrot.lane.b32.xlu1 %v4785_v2, %s4434_s18 }
 0x943   : > { %1906 = vrot.lane.b32.xlu0 %v4789_v5, %s4434_s18 }
 0x962   : > { %2117 = vmax.xlane.f32.xlu0 %v2116_v24 }
 0x966   : > { %2120 = vmax.xlane.f32.xlu0 %v2119_v27  ;;  %2114 = vmax.xlane.f32.xlu1 %v2113_v28 }
 0x96a   : > { %2123 = vmax.xlane.f32.xlu1 %v2122_v30  ;;  %v4128_v30 = vld [vmem:[%s4639_s29 + $0x30] sm:$0xff]  }
 0x9b6   : > { %v1892_v31 = vpop.xlane.xlu0 %1891 }
 0x9ba   : > { %v1886_v32 = vpop.xlane.xlu0 %1885  ;;  %v1895_v33 = vpop.xlane.xlu1 %1894 }
 0x9bb   : > { %4258 = vrcp.f32 %v1895_v33  ;;  %v4129_v33 = vld [vmem:[%s4639_s29 + $0x38] sm:$0xff]  }
 0x9bc   : > { %4260 = vrcp.f32 %v1886_v32 }
 0x9bd   : > { %4262 = vrcp.f32 %v1892_v31 }
 0x9be   : > { %v1907_v34 = vpop.permute.xlu0 %1906  ;;  %v1889_v37 = vpop.xlane.xlu1 %1888 }
 0x9bf   : > { %4264 = vrcp.f32 %v1889_v37  ;;  %3928 = vmatprep.subr.bf16.mxu0 %v1907_v34 }
 0x9c0   : > { %3929 = vmatpush3.bf16.msra.mxu0 %v1907_v34 }
 0x9c2   : > { %v1909_v39 = vpop.permute.xlu1 %1908 }
 0x9c3   : > { %3930 = vmatprep.subr.bf16.mxu0 %v1909_v39 }
 0x9c4   : > { %3931 = vmatpush3.bf16.msra.mxu0 %v1909_v39 }
 0x9c5   : > { %v4259_v16 = vpop.eup %4258  ;;  %3936 = vmatprep.subr.bf16.mxu0 %v4126_v55 }
 0x9c6   : > { %v4261_v41 = vpop.eup %4260  ;;  %v1903_v44 = vmul.f32 %v4259_v16, %v4255_v9 }
 0x9c7   : > { %v4263_v42 = vpop.eup %4262  ;;  %v1900_v45 = vmul.f32 %v4261_v41, %v4253_v8 }
 0x9c8   : > { %v1902_v47 = vmul.f32 %v4263_v42, %v4251_v6 }
 0x9c9   : > { %v4265_v43 = vpop.eup %4264 }
 0x9ca   : > { %v1901_v46 = vmul.f32 %v4265_v43, %v4257_v12  ;;  %v1905_v49 = vpack.c.bf16 %v1903_v44, %v1902_v47  ;;  %v3630_v44 = vld [vmem:[%s5403_s24] ss:$0 sm:$0xff] }
 0x9cc   : > { %v1904_v48 = vpack.c.bf16 %v1901_v46, %v1900_v45  ;;  %v4322_v46 = vld [vmem:[#allocation2] sm:$0xff] }
 0x9ce   : > { %3932 = vmatprep.mubr.msk.bf16.mxu0 %vm1294_vm1, %v1904_v48 }
 0x9cf   : > { %3933 = vmatmul.mubr.msk.bf16.vlgmr.msra.gmra.mrb[16].mxu0 %vm1294_vm1, %v1905_v49 }
 0x9d0   : > { %3937 = vmatpush3.bf16.msra.mxu0 %v4126_v55 }
 0x9d1   : > { %3938 = vmatprep.subr.bf16.mxu0 %v4127_v4 }
 0x9d4   : > { %3939 = vmatpush3.bf16.msra.mxu0 %v4127_v4 }
 0x9ef   : > { %v2118_v50 = vpop.xlane.xlu0 %2117 }
 0x9f0   : > { %v2126_v22 = vsub.f32 %v2110_v23, %v2118_v50 }
 0x9f2   : > { %v2131_v20 = vmul.f32 1.442695, %v2126_v22  ;;  %v4325_v22 = vld [vmem:[#allocation2 + $0x10] sm:$0xff] }
 0x9f3   : > { %v2121_v51 = vpop.xlane.xlu0 %2120  ;;  %v2115_v52 = vpop.xlane.xlu1 %2114 }
 0x9f4   : > { %v2127_v18 = vsub.f32 %v2111_v25, %v2121_v51  ;;  %v2125_v21 = vsub.f32 %v2109_v26, %v2115_v52  ;;  %v4323_v51 = vld [vmem:[#allocation2 + $0x18] sm:$0xff] }
 0x9f6   : > { %v2133_v53 = vmul.f32 1.442695, %v2127_v18  ;;  %v2129_v54 = vmul.f32 1.442695, %v2125_v21  ;;  %v4324_v18 = vld [vmem:[#allocation2 + $0x8] sm:$0xff] }
 0x9f7   : > { %v2124_v17 = vpop.xlane.xlu1 %2123 }
 0x9f8   : > { %4266 = vpow2.f32 %v2133_v53  ;;  %v2128_v19 = vsub.f32 %v2112_v29, %v2124_v17 }
 0x9f9   : > { %4268 = vpow2.f32 %v2129_v54 }
 0x9fa   : > { %v2135_v56 = vmul.f32 1.442695, %v2128_v19 }
 0x9fc   : > { %4270 = vpow2.f32 %v2135_v56  ;;  %v4132_v56 = vld [vmem:[%s4663_s20 + $0x4] ss:$16 sps:$4 sm:$0xff]  }
 0x9fd   : > { %4272 = vpow2.f32 %v2131_v20  ;;  %v4130_v20 = vld [vmem:[%s4663_s20] ss:$16 sps:$4 sm:$0xff]   ;;  %2590 = vmatprep.subr.bf16.mxu1 %v4132_v56 }
 0x9fe   : > { %2591 = vmatpush1.bf16.msra.mxu1 %v4130_v20 }
 0xa02   : > { %v4267_v58 = vpop.eup %4266 }
 0xa03   : > { %v2143_v59 = vsel %vm1294_vm1, %v4267_v58, 0.0  ;;  %v4269_v61 = vpop.eup %4268 }
 0xa04   : > { %2144 = vadd.xlane.f32.xlu0 %v2143_v59  ;;  %v2137_v63 = vsel %vm1294_vm1, %v4269_v61, 0.0  ;;  %v4135_v59 = vld [vmem:[%s4663_s20 + $0xc] ss:$16 sps:$4 sm:$0xff]  }
 0xa06   : > { %v4271_v62 = vpop.eup %4270 }
 0xa07   : > { %v2146_v0 = vsel %vm1294_vm1, %v4271_v62, 0.0  ;;  %v4273_v1 = vpop.eup %4272 }
 0xa08   : > { %2138 = vadd.xlane.f32.xlu0 %v2137_v63  ;;  %2147 = vadd.xlane.f32.xlu1 %v2146_v0  ;;  %v2140_v3 = vsel %vm1294_vm1, %v4273_v1, 0.0  ;;  %v4136_v63 = vld [vmem:[%s4663_s20 + $0x20] ss:$16 sps:$4 sm:$0xff]   ;;  %v4139_v0 = vld [vmem:[%s4663_s20 + $0x28] ss:$16 sps:$4 sm:$0xff]  }
 0xa0c   : > { %2141 = vadd.xlane.f32.xlu1 %v2140_v3 }
 0xa1d   : > { %2161 = vrot.lane.b32.xlu1 %v4785_v2, %s4435_s7 }
 0xa1e   : > { %2159 = vrot.lane.b32.xlu0 %v4789_v5, %s4435_s7 }
 0xa91   : > { %v2145_v57 = vpop.xlane.xlu0 %2144 }
 0xa95   : > { %v2139_v13 = vpop.xlane.xlu0 %2138  ;;  %v2148_v14 = vpop.xlane.xlu1 %2147 }
 0xa96   : > { %4274 = vrcp.f32 %v2139_v13 }
 0xa99   : > { %v2160_v6 = vpop.permute.xlu0 %2159  ;;  %v2142_v7 = vpop.xlane.xlu1 %2141 }
 0xa9a   : > { %4276 = vrcp.f32 %v2142_v7  ;;  %3952 = vmatprep.subr.bf16.mxu0 %v2160_v6 }
 0xa9b   : > { %4278 = vrcp.f32 %v2148_v14 }
 0xa9c   : > { %4280 = vrcp.f32 %v2145_v57 }
 0xa9d   : > { %v2162_v28 = vpop.permute.xlu1 %2161 }
 0xaa0   : > { %v4275_v8 = vpop.eup %4274 }
 0xaa1   : > { %v2153_v23 = vmul.f32 %v4275_v8, %v4269_v61  ;;  %v4138_v61 = vld [vmem:[%s4663_s20 + $0x24] ss:$16 sps:$4 sm:$0xff]  }
 0xaa2   : > { %v3934_v9 = vpop.f32.mrb[16].mxu0  ;;  %2592 = vmatprep.subr.bf16.mxu1 %v4138_v61 }
 0xaa3   : > { %v1952_v10 = vpop.f32.mrb[17].mxu0  ;;  %2593 = vmatpush1.bf16.msra.mxu1 %v4136_v63  ;;  %v3631_v63 = vld [vmem:[%s5404_s21] ss:$0 sm:$0xff] }
 0xaa4   : > { %v4277_v11 = vpop.eup %4276  ;;  %v3935_v12 = vpop.f32.mrb[18].mxu0 }
 0xaa5   : > { %v1968_v2 = vpack.c.bf16 %v3935_v12, %v3934_v9  ;;  %v1955_v15 = vpop.f32.mrb[19].mxu0  ;;  %v2154_v5 = vmul.f32 %v4277_v11, %v4273_v1  ;;  %v4279_v26 = vpop.eup %4278 }
 0xaa6   : > { %v1967_v24 = vpack.c.bf16 %v1955_v15, %v1952_v10  ;;  %v4281_v27 = vpop.eup %4280  ;;  %v2156_v29 = vmul.f32 %v4279_v26, %v4271_v62  ;;  %v4141_v62 = vld [vmem:[%s4663_s20 + $0x2c] ss:$16 sps:$4 sm:$0xff]   ;;  %v4150_v26 = vld [vmem:[%s4663_s20 + $0x64] ss:$16 sps:$4 sm:$0xff]  }
 0xaa7   : > { %v2157_v25 = vpack.c.bf16 %v2154_v5, %v2153_v23  ;;  %v2155_v31 = vmul.f32 %v4281_v27, %v4267_v58  ;;  %v4133_v58 = vld [vmem:[%s4663_s20 + $0x8] ss:$16 sps:$4 sm:$0xff]   ;;  %v4144_v23 = vld [vmem:[%s4663_s20 + $0x44] ss:$16 sps:$4 sm:$0xff]   ;;  %v4147_v5 = vld [vmem:[%s4663_s20 + $0x4c] ss:$16 sps:$4 sm:$0xff]  }
 0xaa8   : > { %3940 = vmatprep.mubr.msk.bf16.mxu0 %vm1294_vm1, %v1967_v24  ;;  %v4142_v24 = vld [vmem:[%s4663_s20 + $0x40] ss:$16 sps:$4 sm:$0xff]   ;;  %2594 = vmatprep.subr.bf16.mxu1 %v4144_v23  ;;  %v4153_v27 = vld [vmem:[%s4663_s20 + $0x6c] ss:$16 sps:$4 sm:$0xff]  }
 0xaa9   : > { %3941 = vmatmul.mubr.msk.bf16.vlgmr.msra.gmra.mrb[12].mxu0 %vm1294_vm1, %v1968_v2  ;;  %v2158_v32 = vpack.c.bf16 %v2156_v29, %v2155_v31  ;;  %2595 = vmatpush1.bf16.msra.mxu1 %v4142_v24  ;;  %v4151_v29 = vld [vmem:[%s4663_s20 + $0x68] ss:$16 sps:$4 sm:$0xff]   ;;  %v4159_v31 = vld [vmem:[%s4663_s20 + $0x8c] ss:$16 sps:$4 sm:$0xff]  }
 0xaaa   : > { %3953 = vmatpush3.bf16.msra.mxu0 %v2160_v6  ;;  %3956 = vmatprep.mubr.msk.bf16.mxu0 %vm1294_vm1, %v2157_v25  ;;  %v4145_v25 = vld [vmem:[%s4663_s20 + $0x48] ss:$16 sps:$4 sm:$0xff]  }
 0xaab   : > { %3954 = vmatprep.subr.bf16.mxu0 %v2162_v28  ;;  %2596 = vmatprep.subr.bf16.mxu1 %v4150_v26  ;;  %v4181_v26 = vld [vmem:[%s4673_s1 + $0x80] sm:$0xff]  }
 0xaae   : > { %3955 = vmatpush3.bf16.msra.mxu0 %v2162_v28  ;;  %v4148_v28 = vld [vmem:[%s4663_s20 + $0x60] ss:$16 sps:$4 sm:$0xff]  }
 0xaaf   : > { %3960 = vmatprep.subr.bf16.mxu0 %v4128_v30  ;;  %2597 = vmatpush1.bf16.msra.mxu1 %v4148_v28  ;;  %v4184_v28 = vld [vmem:[%s4673_s1 + $0x8] sm:$0xff]  }
 0xab1   : > { %3957 = vmatmul.mubr.msk.bf16.vlgmr.msra.gmra.mrb[20].mxu0 %vm1294_vm1, %v2158_v32  ;;  %v4154_v32 = vld [vmem:[%s4663_s20 + $0x80] ss:$16 sps:$4 sm:$0xff]  }
 0xab2   : > { %3961 = vmatpush3.bf16.msra.mxu0 %v4128_v30  ;;  %v4156_v30 = vld [vmem:[%s4663_s20 + $0x84] ss:$16 sps:$4 sm:$0xff]  }
 0xab3   : > { %3962 = vmatprep.subr.bf16.mxu0 %v4129_v33  ;;  %2598 = vmatprep.subr.bf16.mxu1 %v4156_v30  ;;  %v4186_v30 = vld [vmem:[%s4673_s1 + $0x50] sm:$0xff]  }
 0xab4   : > { %2599 = vmatpush1.bf16.msra.mxu1 %v4154_v32  ;;  %v4188_v32 = vld [vmem:[%s4673_s1 + $0x10] sm:$0xff]  }
 0xab6   : > { %3963 = vmatpush3.bf16.msra.mxu0 %v4129_v33  ;;  %v4157_v33 = vld [vmem:[%s4663_s20 + $0x88] ss:$16 sps:$4 sm:$0xff]  }
 0xab7   : > { %2643 = vmatprep.subr.bf16.mxu0 %v4135_v59 }
 0xb84   : > { %v3958_v34 = vpop.f32.mrb[20].mxu0 }
 0xb85   : > { %v2205_v37 = vpop.f32.mrb[21].mxu0 }
 0xb86   : > { %v3959_v39 = vpop.f32.mrb[22].mxu0 }
 0xb87   : > { %v2221_v16 = vpack.c.bf16 %v3959_v39, %v3958_v34  ;;  %v2208_v41 = vpop.f32.mrb[23].mxu0  ;;  %v4162_v34 = vld [vmem:[%s4663_s20 + $0xa4] ss:$16 sps:$4 sm:$0xff]   ;;  %v4160_v39 = vld [vmem:[%s4663_s20 + $0xa0] ss:$16 sps:$4 sm:$0xff]  }
 0xb88   : > { %v2220_v42 = vpack.c.bf16 %v2208_v41, %v2205_v37  ;;  %v4165_v37 = vld [vmem:[%s4663_s20 + $0xac] ss:$16 sps:$4 sm:$0xff]   ;;  %2600 = vmatprep.subr.bf16.mxu1 %v4162_v34  ;;  %v4168_v41 = vld [vmem:[%s4663_s20 + $0xc4] ss:$16 sps:$4 sm:$0xff]  }
 0xb89   : > { %2601 = vmatpush1.bf16.msra.mxu1 %v4160_v39  ;;  %v4190_v34 = vld [vmem:[%s4673_s1 + $0x58] sm:$0xff]  }
 0xb8a   : > { %3964 = vmatprep.mubr.msk.bf16.mxu0 %vm1294_vm1, %v2220_v42  ;;  %v4171_v42 = vld [vmem:[%s4663_s20 + $0xcc] ss:$16 sps:$4 sm:$0xff]   ;;  %2602 = vmatprep.subr.bf16.mxu1 %v4168_v41  ;;  %v4194_v41 = vld [vmem:[%s4673_s1 + $0x60] sm:$0xff]  }
 0xb8b   : > { %3965 = vmatmul.mubr.msk.bf16.vlgmr.msra.gmra.mrb[12].mxu0 %vm1294_vm1, %v2221_v16  ;;  %v4163_v16 = vld [vmem:[%s4663_s20 + $0xa8] ss:$16 sps:$4 sm:$0xff]  }
 0xb8c   : > { %2675 = vmatprep.mubr.bf16.mxu0 %v4432_v60  ;;  %2644 = vmatpush1.bf16.msra.mxu0 %v4133_v58  ;;  %v4192_v39 = vld [vmem:[%s4673_s1 + $0x18] sm:$0xff]  }
 0xb8d   : > { %2645 = vmatprep.subr.bf16.mxu0 %v4141_v62 }
 0xb90   : > { %2646 = vmatpush1.bf16.msra.mxu0 %v4139_v0 }
 0xb91   : > { %2647 = vmatprep.subr.bf16.mxu0 %v4147_v5 }
 0xb94   : > { %2648 = vmatpush1.bf16.msra.mxu0 %v4145_v25  ;;  %v4180_v25 = vld [vmem:[%s4673_s1] sm:$0xff]  }
 0xb95   : > { %2649 = vmatprep.subr.bf16.mxu0 %v4153_v27  ;;  %v4183_v27 = vld [vmem:[%s4673_s1 + $0xc8] sm:$0xff]  }
 0xb98   : > { %2650 = vmatpush1.bf16.msra.mxu0 %v4151_v29  ;;  %v4185_v29 = vld [vmem:[%s4673_s1 + $0x88] sm:$0xff]  }
 0xb99   : > { %2651 = vmatprep.subr.bf16.mxu0 %v4159_v31  ;;  %v4187_v31 = vld [vmem:[%s4673_s1 + $0xd0] sm:$0xff]  }
 0xb9c   : > { %2652 = vmatpush1.bf16.msra.mxu0 %v4157_v33  ;;  %v4189_v33 = vld [vmem:[%s4673_s1 + $0x90] sm:$0xff]  }
 0xb9d   : > { %2653 = vmatprep.subr.bf16.mxu0 %v4165_v37  ;;  %v4191_v37 = vld [vmem:[%s4673_s1 + $0xd8] sm:$0xff]  }
 0xba0   : > { %2654 = vmatpush1.bf16.msra.mxu0 %v4163_v16  ;;  %v4193_v16 = vld [vmem:[%s4673_s1 + $0x98] sm:$0xff]  }
 0xba1   : > { %2655 = vmatprep.subr.bf16.mxu0 %v4171_v42  ;;  %v4195_v42 = vld [vmem:[%s4673_s1 + $0xe0] sm:$0xff]  }
 0xc5e   : > { %v3966_v43 = vpop.f32.mrb[12].mxu0 }
 0xc5f   : > { %v2274_v45 = vpop.f32.mrb[13].mxu0  ;;  %v2295_v53 = vadd.f32 %v4325_v22, %v3966_v43  ;;  %v4166_v43 = vld [vmem:[%s4663_s20 + $0xc0] ss:$16 sps:$4 sm:$0xff]  }
 0xc60   : > { %v2293_v47 = vadd.f32 %v4322_v46, %v2274_v45  ;;  %v3967_v48 = vpop.f32.mrb[14].mxu0  ;;  %v4174_v45 = vld [vmem:[%s4663_s20 + $0xe4] ss:$16 sps:$4 sm:$0xff]   ;;  %v4177_v46 = vld [vmem:[%s4663_s20 + $0xec] ss:$16 sps:$4 sm:$0xff]   ;;  %2603 = vmatpush1.bf16.msra.mxu1 %v4166_v43 }
 0xc61   : > { %v2277_v49 = vpop.f32.mrb[15].mxu0  ;;  %v2296_v52 = vadd.f32 %v4323_v51, %v3967_v48  ;;  %v4983_v19 = vadd.f32 %v3630_v44, %v2295_v53  ;;  %v4175_v48 = vld [vmem:[%s4663_s20 + $0xe8] ss:$16 sps:$4 sm:$0xff]   ;;  %2604 = vmatprep.subr.bf16.mxu1 %v4174_v45  ;;  %v4196_v43 = vld [vmem:[%s4673_s1 + $0x20] sm:$0xff]  }
 0xc62   : > { %v4975_v50 = vadd.f32 %v3630_v44, %v2293_v47  ;;  %v2294_v21 = vadd.f32 %v4324_v18, %v2277_v49  ;;  %v4172_v47 = vld [vmem:[%s4663_s20 + $0xe0] ss:$16 sps:$4 sm:$0xff]   ;;  %v4198_v45 = vld [vmem:[%s4673_s1 + $0x68] sm:$0xff]  }
 0xc63   : > { %v4980_v17 = vadd.f32 %v3630_v44, %v2296_v52 }
 0xc64   : > { %v4977_v54 = vadd.f32 %v3630_v44, %v2294_v21  ;;  %2310 = vadd.xlane.f32.xlu1 %v4975_v50  ;;  %v4169_v44 = vld [vmem:[%s4663_s20 + $0xc8] ss:$16 sps:$4 sm:$0xff]   ;;  %2605 = vmatpush1.bf16.msra.mxu1 %v4172_v47 }
 0xc65   : > { %2656 = vmatpush1.bf16.msra.mxu0 %v4169_v44  ;;  %v4197_v44 = vld [vmem:[%s4673_s1 + $0xa0] sm:$0xff]   ;;  %v4200_v47 = vld [vmem:[%s4673_s1 + $0x28] sm:$0xff]  }
 0xc66   : > { %2312 = vadd.xlane.f32.xlu0 %v4977_v54  ;;  %2657 = vmatprep.subr.bf16.mxu0 %v4177_v46  ;;  %v4199_v46 = vld [vmem:[%s4673_s1 + $0xe8] sm:$0xff]  }
 0xc68   : > { %2316 = vadd.xlane.f32.xlu1 %v4980_v17 }
 0xc69   : > { %2658 = vmatpush1.bf16.msra.mxu0 %v4175_v48  ;;  %v4201_v48 = vld [vmem:[%s4673_s1 + $0xa8] sm:$0xff]  }
 0xc6a   : > { %2314 = vadd.xlane.f32.xlu0 %v4983_v19 }
 0xcf1   : > { %v2311_v1 = vpop.xlane.xlu1 %2310 }
 0xcf2   : > { %v2318_v3 = vmul.f32 0.0078125, %v2311_v1 }
 0xcf3   : > { %v2313_v55 = vpop.xlane.xlu0 %2312 }
 0xcf4   : > { %v4996_v4 = vsub.f32 %v4975_v50, %v2318_v3  ;;  %v2319_v57 = vmul.f32 0.0078125, %v2313_v55 }
 0xcf5   : > { %v2317_v13 = vpop.xlane.xlu1 %2316 }
 0xcf6   : > { %v4999_v14 = vsub.f32 %v4977_v54, %v2319_v57  ;;  %v2321_v6 = vmul.f32 0.0078125, %v2317_v13  ;;  %v2326_v7 = vmul.f32 %v4996_v4, %v4996_v4  ;;  %v3632_v57 = vld [vmem:[%s5405_s15] ss:$0 sm:$0xff] }
 0xcf7   : > { %v2315_v8 = vpop.xlane.xlu0 %2314 }
 0xcf8   : > { %v5004_v9 = vsub.f32 %v4980_v17, %v2321_v6  ;;  %v2320_v10 = vmul.f32 0.0078125, %v2315_v8  ;;  %2330 = vadd.xlane.f32.xlu0 %v2326_v7  ;;  %v2327_v11 = vmul.f32 %v4999_v14, %v4999_v14 }
 0xcfa   : > { %v5009_v12 = vsub.f32 %v4983_v19, %v2320_v10  ;;  %2332 = vadd.xlane.f32.xlu1 %v2327_v11  ;;  %v2329_v2 = vmul.f32 %v5004_v9, %v5004_v9 }
 0xcfc   : > { %v2328_v15 = vmul.f32 %v5009_v12, %v5009_v12 }
 0xcfe   : > { %2336 = vadd.xlane.f32.xlu1 %v2329_v2  ;;  %2334 = vadd.xlane.f32.xlu0 %v2328_v15 }
 0xd85   : > { %v2331_v49 = vpop.xlane.xlu0 %2330 }
 0xd86   : > { %v2338_v51 = vmul.f32 0.0078125, %v2331_v49  ;;  %v4202_v49 = vld [vmem:[%s4673_s1 + $0x70] sm:$0xff]  }
 0xd87   : > { %v2333_v52 = vpop.xlane.xlu1 %2332 }
 0xd88   : > { %v2342_v18 = vadd.f32 1e-06, %v2338_v51  ;;  %v2339_v21 = vmul.f32 0.0078125, %v2333_v52  ;;  %v4203_v51 = vld [vmem:[%s4673_s1 + $0xf0] sm:$0xff]  }
 0xd89   : > { %v4204_v52 = vld [vmem:[%s4673_s1 + $0x30] sm:$0xff]  }
 0xd8a   : > { %4282 = vrsqrt.f32 %v2342_v18  ;;  %v2343_v22 = vadd.f32 1e-06, %v2339_v21  ;;  %v4205_v18 = vld [vmem:[%s4673_s1 + $0xb0] sm:$0xff]   ;;  %v4206_v21 = vld [vmem:[%s4673_s1 + $0x78] sm:$0xff]  }
 0xd8b   : > { %v2337_v53 = vpop.xlane.xlu1 %2336  ;;  %v2335_v20 = vpop.xlane.xlu0 %2334 }
 0xd8c   : > { %4284 = vrsqrt.f32 %v2343_v22  ;;  %v2341_v56 = vmul.f32 0.0078125, %v2337_v53  ;;  %v2340_v58 = vmul.f32 0.0078125, %v2335_v20  ;;  %v4207_v22 = vld [vmem:[%s4673_s1 + $0xf8] sm:$0xff]  }
 0xd8d   : > { %v4208_v53 = vld [vmem:[%s4673_s1 + $0x38] sm:$0xff]  }
 0xd8e   : > { %v2345_v59 = vadd.f32 1e-06, %v2341_v56  ;;  %v2344_v61 = vadd.f32 1e-06, %v2340_v58  ;;  %v4209_v20 = vld [vmem:[%s4673_s1 + $0xb8] sm:$0xff]   ;;  %v2424_v58 = vsub.s32 3, %v4765_v35 }
 0xd8f   : > { %v2408_v56 = vld [vmem:[%s4668_s27] sm:$0xf] }
 0xd90   : > { %4286 = vrsqrt.f32 %v2345_v59  ;;  %v5091_v59 = vrot.slane %v2408_v56, %v1022_v36 }
 0xd91   : > { %4288 = vrsqrt.f32 %v2344_v61  ;;  %v5095_v61 = vrot.slane %v2408_v56, %v1030_v40 }
 0xd94   : > { %v4283_v62 = vpop.eup %4282 }
 0xd95   : > { %v2350_v0 = vmul.f32 %v4283_v62, %v4996_v4  ;;  %v5099_v62 = vrot.slane %v2408_v56, %v1026_v38 }
 0xd96   : > { %v4285_v1 = vpop.eup %4284 }
 0xd97   : > { %v2351_v3 = vmul.f32 %v4285_v1, %v4999_v14  ;;  %v2360_v55 = vmul.f32 %v3631_v63, %v2350_v0 }
 0xd99   : > { %v2361_v13 = vmul.f32 %v3631_v63, %v2351_v3  ;;  %v2370_v8 = vadd.f32 %v3632_v57, %v2360_v55 }
 0xd9a   : > { %v4287_v6 = vpop.eup %4286 }
 0xd9b   : > { %v4289_v7 = vpop.eup %4288  ;;  %v2371_v10 = vadd.f32 %v3632_v57, %v2361_v13  ;;  %v2353_v11 = vmul.f32 %v4287_v6, %v5004_v9  ;;  %v4178_v9 = vld [vmem:[%s4673_s1 + $0x40] sm:$0xff]  }
 0xd9c   : > { %v2352_v4 = vmul.f32 %v4289_v7, %v5009_v12  ;;  %v4179_v12 = vld [vmem:[%s4673_s1 + $0xc0] sm:$0xff]   ;;  %3777 = vmatprep.subr.bf16.mxu1 %v4178_v9 }
 0xd9d   : > { %v2374_v14 = vpack.c.bf16 %v2371_v10, %v2370_v8  ;;  %v2363_v2 = vmul.f32 %v3631_v63, %v2353_v11  ;;  %3805 = vmatprep.subr.bf16.mxu0 %v4179_v12 }
 0xd9e   : > { %v2362_v15 = vmul.f32 %v3631_v63, %v2352_v4  ;;  %v5101_v63 = vrot.slane %v2408_v56, %v2424_v58 }
 0xd9f   : > { %2623 = vmatmul.mubr.bf16.vlgmr.msra.gmra.mrb[24].mxu1 %v2374_v14  ;;  %2676 = vmatmul.mubr.bf16.vlgmr.msra.gmra.mrb[24].mxu0 %v2374_v14  ;;  %v2373_v5 = vadd.f32 %v3632_v57, %v2363_v2 }
 0xda0   : > { %2632 = vmatprep.mubr.bf16.mxu1 %v4432_v60  ;;  %2685 = vmatprep.mubr.bf16.mxu0 %v4432_v60  ;;  %v2372_v23 = vadd.f32 %v3632_v57, %v2362_v15  ;;  %v4182_v60 = vld [vmem:[%s4673_s1 + $0x48] sm:$0xff]  }
 0xda1   : > { %3778 = vmatpush3.bf16.msra.mxu1 %v4180_v25  ;;  %3806 = vmatpush3.bf16.msra.mxu0 %v4181_v26 }
 0xda2   : > { %v2375_v24 = vpack.c.bf16 %v2373_v5, %v2372_v23  ;;  %3779 = vmatprep.subr.bf16.mxu1 %v4182_v60  ;;  %3807 = vmatprep.subr.bf16.mxu0 %v4183_v27 }
 0xda5   : > { %3780 = vmatpush3.bf16.msra.mxu1 %v4184_v28  ;;  %3808 = vmatpush3.bf16.msra.mxu0 %v4185_v29 }
 0xda6   : > { %3781 = vmatprep.subr.bf16.mxu1 %v4186_v30  ;;  %3809 = vmatprep.subr.bf16.mxu0 %v4187_v31 }
 0xda7   : > { %2633 = vmatmul.mubr.bf16.gmra.mrb[28].mxu1 %v2375_v24  ;;  %2686 = vmatmul.mubr.bf16.gmra.mrb[28].mxu0 %v2375_v24 }
 0xda9   : > { %3782 = vmatpush3.bf16.msra.mxu1 %v4188_v32  ;;  %3810 = vmatpush3.bf16.msra.mxu0 %v4189_v33 }
 0xdaa   : > { %3783 = vmatprep.subr.bf16.mxu1 %v4190_v34  ;;  %3811 = vmatprep.subr.bf16.mxu0 %v4191_v37 }
 0xdad   : > { %3784 = vmatpush3.bf16.msra.mxu1 %v4192_v39  ;;  %3812 = vmatpush3.bf16.msra.mxu0 %v4193_v16 }
 0xdae   : > { %3785 = vmatprep.subr.bf16.mxu1 %v4194_v41  ;;  %3813 = vmatprep.subr.bf16.mxu0 %v4195_v42 }
 0xdb1   : > { %3786 = vmatpush3.bf16.msra.mxu1 %v4196_v43  ;;  %3814 = vmatpush3.bf16.msra.mxu0 %v4197_v44 }
 0xdb2   : > { %3787 = vmatprep.subr.bf16.mxu1 %v4198_v45  ;;  %3815 = vmatprep.subr.bf16.mxu0 %v4199_v46 }
 0xdb5   : > { %3788 = vmatpush3.bf16.msra.mxu1 %v4200_v47  ;;  %3816 = vmatpush3.bf16.msra.mxu0 %v4201_v48 }
 0xdb6   : > { %3789 = vmatprep.subr.bf16.mxu1 %v4202_v49  ;;  %3817 = vmatprep.subr.bf16.mxu0 %v4203_v51 }
 0xdb9   : > { %3790 = vmatpush3.bf16.msra.mxu1 %v4204_v52  ;;  %3818 = vmatpush3.bf16.msra.mxu0 %v4205_v18 }
 0xdba   : > { %3791 = vmatprep.subr.bf16.mxu1 %v4206_v21  ;;  %3819 = vmatprep.subr.bf16.mxu0 %v4207_v22 }
 0xdbd   : > { %3792 = vmatpush3.bf16.msra.mxu1 %v4208_v53  ;;  %3820 = vmatpush3.bf16.msra.mxu0 %v4209_v20 }
 0xe72   : > { %v2624_v0 = vpop.f32.mrb[24].mxu1  ;;  %v2677_v1 = vpop.f32.mrb[24].mxu0 }
 0xe73   : > { %v5104_v3 = vadd.f32 %v2624_v0, %v5091_v59  ;;  %v5107_v55 = vadd.f32 %v2677_v1, %v5095_v61  ;;  %v2626_v36 = vpop.f32.mrb[25].mxu1  ;;  %v2679_v57 = vpop.f32.mrb[25].mxu0 }
 0xe74   : > { %v5110_v13 = vadd.f32 %v2626_v36, %v5099_v62  ;;  %v5113_v40 = vadd.f32 %v2679_v57, %v5101_v63  ;;  %v2628_v35 = vpop.f32.mrb[26].mxu1  ;;  %v2681_v38 = vpop.f32.mrb[26].mxu0 }
 0xe75   : > { %v2696_v6 = vmul.f32 %v5104_v3, %v5104_v3  ;;  %v2698_v7 = vmul.f32 %v5107_v55, %v5107_v55  ;;  %v5120_v8 = vadd.f32 %v2628_v35, %v5091_v59  ;;  %v5123_v10 = vadd.f32 %v2681_v38, %v5095_v61  ;;  %v2630_v11 = vpop.f32.mrb[27].mxu1  ;;  %v2683_v4 = vpop.f32.mrb[27].mxu0 }
 0xe76   : > { %v2697_v14 = vmul.f32 %v5110_v13, %v5110_v13  ;;  %v2699_v2 = vmul.f32 %v5113_v40, %v5113_v40  ;;  %v5130_v15 = vadd.f32 %v2630_v11, %v5099_v62  ;;  %v5133_v23 = vadd.f32 %v2683_v4, %v5101_v63 }
 0xe77   : > { %v2712_v5 = vmul.f32 %v2696_v6, %v5104_v3  ;;  %v2714_v24 = vmul.f32 %v2698_v7, %v5107_v55  ;;  %v2700_v9 = vmul.f32 %v5120_v8, %v5120_v8  ;;  %v2702_v12 = vmul.f32 %v5123_v10, %v5123_v10 }
 0xe78   : > { %v2713_v25 = vmul.f32 %v2697_v14, %v5110_v13  ;;  %v2715_v26 = vmul.f32 %v2699_v2, %v5113_v40  ;;  %v2701_v60 = vmul.f32 %v5130_v15, %v5130_v15  ;;  %v2703_v27 = vmul.f32 %v5133_v23, %v5133_v23 }
 0xe79   : > { %v2728_v28 = vmul.f32 0.044715, %v2712_v5  ;;  %v2730_v29 = vmul.f32 0.044715, %v2714_v24  ;;  %v2716_v30 = vmul.f32 %v2700_v9, %v5120_v8  ;;  %v2718_v31 = vmul.f32 %v2702_v12, %v5123_v10 }
 0xe7a   : > { %v2729_v32 = vmul.f32 0.044715, %v2713_v25  ;;  %v2731_v33 = vmul.f32 0.044715, %v2715_v26  ;;  %v2717_v34 = vmul.f32 %v2701_v60, %v5130_v15  ;;  %v2719_v37 = vmul.f32 %v2703_v27, %v5133_v23  ;;  %v2634_v39 = vpop.f32.mrb[28].mxu1  ;;  %v2687_v16 = vpop.f32.mrb[28].mxu0 }
 0xe7b   : > { %v2744_v41 = vadd.f32 %v2728_v28, %v5104_v3  ;;  %v2746_v42 = vadd.f32 %v2730_v29, %v5107_v55  ;;  %v2732_v43 = vmul.f32 0.044715, %v2716_v30  ;;  %v2734_v44 = vmul.f32 0.044715, %v2718_v31  ;;  %v2636_v45 = vpop.f32.mrb[29].mxu1  ;;  %v2689_v46 = vpop.f32.mrb[29].mxu0 }
 0xe7c   : > { %v2745_v47 = vadd.f32 %v2729_v32, %v5110_v13  ;;  %v2747_v48 = vadd.f32 %v2731_v33, %v5113_v40  ;;  %v2733_v49 = vmul.f32 0.044715, %v2717_v34  ;;  %v2735_v51 = vmul.f32 0.044715, %v2719_v37  ;;  %v2638_v52 = vpop.f32.mrb[30].mxu1  ;;  %v2691_v18 = vpop.f32.mrb[30].mxu0 }
 0xe7d   : > { %v2760_v21 = vmul.f32 0.7978846, %v2744_v41  ;;  %v2762_v22 = vmul.f32 0.7978846, %v2746_v42  ;;  %v2748_v53 = vadd.f32 %v2732_v43, %v5120_v8  ;;  %v2750_v20 = vadd.f32 %v2734_v44, %v5123_v10  ;;  %v2640_v56 = vpop.f32.mrb[31].mxu1  ;;  %v2693_v58 = vpop.f32.mrb[31].mxu0 }
 0xe7e   : > { %v2761_v0 = vmul.f32 0.7978846, %v2745_v47  ;;  %v2763_v1 = vmul.f32 0.7978846, %v2747_v48  ;;  %v2749_v36 = vadd.f32 %v2733_v49, %v5130_v15  ;;  %v2751_v57 = vadd.f32 %v2735_v51, %v5133_v23 }
 0xe7f   : > { %4290 = vtanh.f32 %v2760_v21  ;;  %v2764_v35 = vmul.f32 0.7978846, %v2748_v53  ;;  %v2766_v38 = vmul.f32 0.7978846, %v2750_v20  ;;  %v5160_v6 = vadd.f32 %v2634_v39, %v5091_v59 }
 0xe80   : > { %4292 = vtanh.f32 %v2762_v22  ;;  %v2765_v7 = vmul.f32 0.7978846, %v2749_v36  ;;  %v2767_v11 = vmul.f32 0.7978846, %v2751_v57  ;;  %v5163_v4 = vadd.f32 %v2687_v16, %v5095_v61 }
 0xe81   : > { %4294 = vtanh.f32 %v2761_v0  ;;  %v2704_v14 = vmul.f32 %v5160_v6, %v5160_v6  ;;  %v5168_v2 = vadd.f32 %v2636_v45, %v5099_v62  ;;  %v5171_v5 = vadd.f32 %v2689_v46, %v5101_v63 }
 0xe82   : > { %4296 = vtanh.f32 %v2763_v1  ;;  %v2706_v24 = vmul.f32 %v5163_v4, %v5163_v4  ;;  %v5176_v9 = vadd.f32 %v2638_v52, %v5091_v59  ;;  %v5179_v12 = vadd.f32 %v2691_v18, %v5095_v61 }
 0xe83   : > { %4298 = vtanh.f32 %v2764_v35  ;;  %v2720_v25 = vmul.f32 %v2704_v14, %v5160_v6  ;;  %v2705_v26 = vmul.f32 %v5168_v2, %v5168_v2  ;;  %v2707_v60 = vmul.f32 %v5171_v5, %v5171_v5 }
 0xe84   : > { %4300 = vtanh.f32 %v2766_v38  ;;  %v2722_v27 = vmul.f32 %v2706_v24, %v5163_v4  ;;  %v2708_v28 = vmul.f32 %v5176_v9, %v5176_v9  ;;  %v2710_v59 = vmul.f32 %v5179_v12, %v5179_v12 }
 0xe85   : > { %4302 = vtanh.f32 %v2765_v7  ;;  %v2736_v61 = vmul.f32 0.044715, %v2720_v25  ;;  %v2721_v29 = vmul.f32 %v2705_v26, %v5168_v2  ;;  %v2723_v30 = vmul.f32 %v2707_v60, %v5171_v5 }
 0xe86   : > { %4304 = vtanh.f32 %v2767_v11  ;;  %v2738_v31 = vmul.f32 0.044715, %v2722_v27  ;;  %v2724_v32 = vmul.f32 %v2708_v28, %v5176_v9  ;;  %v2726_v33 = vmul.f32 %v2710_v59, %v5179_v12 }
 0xe87   : > { %v2752_v34 = vadd.f32 %v2736_v61, %v5160_v6  ;;  %v2737_v37 = vmul.f32 0.044715, %v2721_v29  ;;  %v2739_v39 = vmul.f32 0.044715, %v2723_v30  ;;  %v5197_v16 = vadd.f32 %v2640_v56, %v5099_v62 }
 0xe88   : > { %v2754_v41 = vadd.f32 %v2738_v31, %v5163_v4  ;;  %v2740_v42 = vmul.f32 0.044715, %v2724_v32  ;;  %v2742_v43 = vmul.f32 0.044715, %v2726_v33  ;;  %v5201_v44 = vadd.f32 %v2693_v58, %v5101_v63 }
 0xe89   : > { %v4291_v45 = vpop.eup %4290  ;;  %v2768_v46 = vmul.f32 0.7978846, %v2752_v34  ;;  %v2753_v47 = vadd.f32 %v2737_v37, %v5168_v2  ;;  %v2755_v48 = vadd.f32 %v2739_v39, %v5171_v5  ;;  %v2709_v49 = vmul.f32 %v5197_v16, %v5197_v16 }
 0xe8a   : > { %v4293_v51 = vpop.eup %4292  ;;  %v2792_v52 = vadd.f32 1.0, %v4291_v45  ;;  %v2770_v62 = vmul.f32 0.7978846, %v2754_v41  ;;  %v2756_v18 = vadd.f32 %v2740_v42, %v5176_v9  ;;  %v2758_v21 = vadd.f32 %v2742_v43, %v5179_v12 }
 0xe8b   : > { %v4295_v22 = vpop.eup %4294  ;;  %v2794_v53 = vadd.f32 1.0, %v4293_v51  ;;  %4306 = vtanh.f32 %v2768_v46  ;;  %v2769_v63 = vmul.f32 0.7978846, %v2753_v47  ;;  %v2771_v20 = vmul.f32 0.7978846, %v2755_v48 }
 0xe8c   : > { %v4297_v56 = vpop.eup %4296  ;;  %v2808_v58 = vmul.f32 0.5, %v2792_v52  ;;  %4308 = vtanh.f32 %v2770_v62  ;;  %v2772_v0 = vmul.f32 0.7978846, %v2756_v18  ;;  %v2774_v1 = vmul.f32 0.7978846, %v2758_v21 }
 0xe8d   : > { %v4299_v36 = vpop.eup %4298  ;;  %v2810_v57 = vmul.f32 0.5, %v2794_v53  ;;  %4310 = vtanh.f32 %v2769_v63  ;;  %v2725_v35 = vmul.f32 %v2709_v49, %v5197_v16  ;;  %v2711_v38 = vmul.f32 %v5201_v44, %v5201_v44 }
 0xe8e   : > { %v4301_v7 = vpop.eup %4300  ;;  %v2824_v11 = vmul.f32 %v2808_v58, %v5104_v3  ;;  %v2796_v14 = vadd.f32 1.0, %v4299_v36  ;;  %4312 = vtanh.f32 %v2771_v20  ;;  %v2793_v24 = vadd.f32 1.0, %v4295_v22 }
 0xe8f   : > { %v4303_v25 = vpop.eup %4302  ;;  %v2826_v26 = vmul.f32 %v2810_v57, %v5107_v55  ;;  %v2798_v60 = vadd.f32 1.0, %v4301_v7  ;;  %4314 = vtanh.f32 %v2772_v0  ;;  %v2741_v27 = vmul.f32 0.044715, %v2725_v35 }
 0xe90   : > { %v4305_v28 = vpop.eup %4304  ;;  %v2812_v59 = vmul.f32 0.5, %v2796_v14  ;;  %4316 = vtanh.f32 %v2774_v1  ;;  %v2727_v61 = vmul.f32 %v2711_v38, %v5201_v44  ;;  %v2797_v29 = vadd.f32 1.0, %v4303_v25 }
 0xe91   : > { %v2814_v30 = vmul.f32 0.5, %v2798_v60  ;;  %v2757_v31 = vadd.f32 %v2741_v27, %v5197_v16  ;;  %v2809_v32 = vmul.f32 0.5, %v2793_v24  ;;  %v2795_v3 = vadd.f32 1.0, %v4297_v56 }
 0xe92   : > { %v2828_v33 = vmul.f32 %v2812_v59, %v5120_v8  ;;  %v2743_v34 = vmul.f32 0.044715, %v2727_v61  ;;  %v2813_v37 = vmul.f32 0.5, %v2797_v29  ;;  %v2799_v39 = vadd.f32 1.0, %v4305_v28 }
 0xe93   : > { %v2830_v55 = vmul.f32 %v2814_v30, %v5123_v10  ;;  %v2773_v41 = vmul.f32 0.7978846, %v2757_v31  ;;  %v2825_v42 = vmul.f32 %v2809_v32, %v5110_v13  ;;  %v2811_v43 = vmul.f32 0.5, %v2795_v3  ;;  %v3665_v3 = vld [vmem:[%s809_s22] ss:$0 sm:$0xff]  ;;  %s5408_s22 = sld [smem:[#allocation25_spill]] (!%p3698_p1) }
 0xe94   : > { %v2840_v45 = vpack.c.bf16 %v2828_v33, %v2824_v11  ;;  %v2759_v46 = vadd.f32 %v2743_v34, %v5201_v44  ;;  %v2829_v47 = vmul.f32 %v2813_v37, %v5130_v15  ;;  %v2815_v48 = vmul.f32 0.5, %v2799_v39 }
 0xe95   : > { %v4307_v49 = vpop.eup %4306  ;;  %v2842_v51 = vpack.c.bf16 %v2830_v55, %v2826_v26  ;;  %4318 = vtanh.f32 %v2773_v41  ;;  %v2827_v8 = vmul.f32 %v2811_v43, %v5113_v40 }
 0xe96   : > { %v4309_v52 = vpop.eup %4308  ;;  %v2775_v62 = vmul.f32 0.7978846, %v2759_v46  ;;  %v2841_v18 = vpack.c.bf16 %v2829_v47, %v2825_v42  ;;  %v2831_v10 = vmul.f32 %v2815_v48, %v5133_v23  ;;  %v2800_v21 = vadd.f32 1.0, %v4307_v49 }
 0xe97   : > { %v4311_v22 = vpop.eup %4310  ;;  %v2802_v13 = vadd.f32 1.0, %v4309_v52 }
 0xe98   : > { %v4313_v53 = vpop.eup %4312  ;;  %4320 = vtanh.f32 %v2775_v62  ;;  %3143 = vmatprep.mubr.bf16.mxu1 %v2841_v18  ;;  %v2843_v63 = vpack.c.bf16 %v2831_v10, %v2827_v8  ;;  %v2816_v58 = vmul.f32 0.5, %v2800_v21  ;;  %v2801_v1 = vadd.f32 1.0, %v4311_v22 }
 0xe99   : > { %v4315_v20 = vpop.eup %4314  ;;  %3144 = vmatmul.mubr.bf16.vlgmr.msra.gmra.mrb[32].mxu1 %v2840_v45  ;;  %v2818_v0 = vmul.f32 0.5, %v2802_v13  ;;  %v2803_v7 = vadd.f32 1.0, %v4313_v53 }
 0xe9a   : > { %v4317_v15 = vpop.eup %4316  ;;  %3192 = vmatprep.mubr.bf16.mxu0 %v2843_v63  ;;  %v2804_v56 = vadd.f32 1.0, %v4315_v20  ;;  %v2832_v23 = vmul.f32 %v2816_v58, %v5160_v6  ;;  %v2817_v25 = vmul.f32 0.5, %v2801_v1  ;;  %v4326_v1 = vld [vmem:[%s5407_s3] sm:$0xff] (!%p3698_p1)  }
 0xe9b   : > { %3193 = vmatmul.mubr.bf16.vlgmr.msra.gmra.mrb[32].mxu0 %v2842_v51  ;;  %v2806_v40 = vadd.f32 1.0, %v4317_v15  ;;  %v2834_v11 = vmul.f32 %v2818_v0, %v5163_v4  ;;  %v2819_v61 = vmul.f32 0.5, %v2803_v7  ;;  %v4328_v7 = vld [vmem:[%s5407_s3 + $0x10] sm:$0xff] (!%p3698_p1)  }
 0xe9c   : > { %v2820_v36 = vmul.f32 0.5, %v2804_v56  ;;  %v2833_v29 = vmul.f32 %v2817_v25, %v5168_v2  ;;  %v4332_v25 = vld [vmem:[%s5407_s3 + $0x30] sm:$0xff] (!%p3698_p1)  }
 0xe9d   : > { %v2822_v57 = vmul.f32 0.5, %v2806_v40  ;;  %v2835_v31 = vmul.f32 %v2819_v61, %v5171_v5  ;;  %v3221_v61 = vld [vmem:[%s5408_s22] sm:$0x1] (!%p3698_p1) }
 0xe9e   : > { %v2836_v35 = vmul.f32 %v2820_v36, %v5176_v9  ;;  %v4436_v36 = vmov (!%p3698_p1), 0.0  }
 0xe9f   : > { %v4319_v38 = vpop.eup %4318  ;;  %v2838_v14 = vmul.f32 %v2822_v57, %v5179_v12  ;;  %3968 = vmatprep.subr.bf16.mxu0 (!%p3698_p1), %v4436_v36 }
 0xea0   : > { %v2805_v24 = vadd.f32 1.0, %v4319_v38  ;;  %v2844_v26 = vpack.c.bf16 %v2836_v35, %v2832_v23  ;;  %3969 = vmatpush3.bf16.msra.mxu0 (!%p3698_p1), %v4326_v1 }
 0xea1   : > { %v2846_v60 = vpack.c.bf16 %v2838_v14, %v2834_v11  ;;  %3970 = vmatprep.subr.bf16.mxu0 (!%p3698_p1), %v4436_v36  ;;  %v4329_v11 = vld [vmem:[%s5407_s3 + $0x18] sm:$0xff] (!%p3698_p1)   ;;  %v4330_v14 = vld [vmem:[%s5407_s3 + $0x20] sm:$0xff] (!%p3698_p1)  }
 0xea2   : > { %v4321_v27 = vpop.eup %4320  ;;  %v2821_v28 = vmul.f32 0.5, %v2805_v24  ;;  %v4331_v24 = vld [vmem:[%s5407_s3 + $0x28] sm:$0xff] (!%p3698_p1)  }
 0xea3   : > { %v2807_v59 = vadd.f32 1.0, %v4321_v27 }
 0xea4   : > { %v2837_v6 = vmul.f32 %v2821_v28, %v5197_v16 }
 0xea5   : > { %v2823_v9 = vmul.f32 0.5, %v2807_v59 }
 0xea6   : > { %v2845_v30 = vpack.c.bf16 %v2837_v6, %v2833_v29  ;;  %v3222_v6 = vld [vmem:[%s5409_s19] sm:$0x1] (!%p3698_p1) }
 0xea7   : > { %v2839_v4 = vmul.f32 %v2823_v9, %v5201_v44 }
 0xea8   : > { %3151 = vmatprep.mubr.bf16.mxu1 %v2845_v30 }
 0xea9   : > { %v2847_v12 = vpack.c.bf16 %v2839_v4, %v2835_v31  ;;  %3152 = vmatmul.mubr.bf16.gmra.mrb[36].mxu1 %v2844_v26  ;;  %v4333_v26 = vld [vmem:[%s5407_s3 + $0x38] sm:$0xff] (!%p3698_p1)   ;;  %v3256_v4 = vld [vmem:[%s5410_s26] sm:$0x1] (!%p3698_p1) }
 0xeab   : > { %3200 = vmatprep.mubr.bf16.mxu0 %v2847_v12 }
 0xeac   : > { %3201 = vmatmul.mubr.bf16.gmra.mrb[36].mxu0 %v2846_v60 }
 0xead   : > { %3984 = vmatprep.mubr.msk.bf16.mxu0 (!%p3698_p1), %vm4437_vm4, %v4436_v36 }
 0xf6c   : > { %v3793_v32 = vpop.f32.mrb[32].mxu1 }
 0xf6d   : > { %v3794_v2 = vpop.f32.mrb[33].mxu1 }
 0xf6e   : > { %v3821_v33 = vpop.f32.mrb[32].mxu0  ;;  %v3795_v16 = vadd.f32 %v3794_v2, %v3793_v32  ;;  %v3796_v34 = vpop.f32.mrb[34].mxu1 }
 0xf6f   : > { %v3822_v37 = vpop.f32.mrb[33].mxu0  ;;  %v3797_v39 = vpop.f32.mrb[35].mxu1 }
 0xf70   : > { %v3146_v5 = vadd.f32 %v3795_v16, %v3665_v3  ;;  %v3823_v55 = vadd.f32 %v3822_v37, %v3821_v33  ;;  %v3824_v44 = vpop.f32.mrb[34].mxu0  ;;  %v3798_v41 = vadd.f32 %v3797_v39, %v3796_v34 }
 0xf71   : > { %v3825_v42 = vpop.f32.mrb[35].mxu0 }
 0xf72   : > { %v3195_v43 = vadd.f32 %v3823_v55, %v3146_v5  ;;  %v3149_v45 = vadd.f32 %v3798_v41, %v3665_v3  ;;  %v3826_v46 = vadd.f32 %v3825_v42, %v3824_v44 }
 0xf74   : > { %v3209_v47 = vadd.f32 %v3195_v43, %v4975_v50  ;;  %v3198_v48 = vadd.f32 %v3826_v46, %v3149_v45 }
 0xf76   : > { %3213 = vst [vmem:[#allocation2] sm:$0xff] %v3209_v47  ;;  %v3210_v49 = vadd.f32 %v3198_v48, %v4977_v54  ;;  %v3224_v0 = vsel (!%p3698_p1), %vm3223_vm3, %v3209_v47, 0.0 }
 0xf77   : > { %3225 = vadd.xlane.f32.xlu0 (!%p3698_p1), %v3224_v0 }
 0xf78   : > { %3214 = vst [vmem:[#allocation2 + $0x8] sm:$0xff] %v3210_v49 }
 0xf7c   : > { %v3799_v51 = vpop.f32.mrb[36].mxu1 }
 0xf7d   : > { %v3800_v8 = vpop.f32.mrb[37].mxu1 }
 0xf7e   : > { %v3801_v52 = vadd.f32 %v3800_v8, %v3799_v51  ;;  %v3802_v62 = vpop.f32.mrb[38].mxu1 }
 0xf7f   : > { %v3827_v18 = vpop.f32.mrb[36].mxu0  ;;  %v3803_v10 = vpop.f32.mrb[39].mxu1 }
 0xf80   : > { %v3154_v21 = vadd.f32 %v3801_v52, %v3665_v3  ;;  %v3828_v22 = vpop.f32.mrb[37].mxu0  ;;  %v3804_v13 = vadd.f32 %v3803_v10, %v3802_v62 }
 0xf81   : > { %v3829_v53 = vadd.f32 %v3828_v22, %v3827_v18  ;;  %v3830_v63 = vpop.f32.mrb[38].mxu0 }
 0xf82   : > { %v3157_v20 = vadd.f32 %v3804_v13, %v3665_v3  ;;  %v3831_v15 = vpop.f32.mrb[39].mxu0 }
 0xf83   : > { %v3203_v56 = vadd.f32 %v3829_v53, %v3154_v21  ;;  %v3832_v50 = vadd.f32 %v3831_v15, %v3830_v63  ;;  %3220 = sbr.rel (%p3698_p1) target bundleno = 4488 (0x1188), region = 104 }
 0xf85   : > { %v3211_v58 = vadd.f32 %v3203_v56, %v4983_v19  ;;  %v3206_v40 = vadd.f32 %v3832_v50, %v3157_v20  ;;  %v4327_v19 = vld [vmem:[%s5407_s3 + $0x8] sm:$0xff] (!%p3698_p1)  }
 0xf86   : > { %3971 = vmatpush3.bf16.msra.mxu0 (!%p3698_p1), %v4327_v19 }
 0xf87   : > { %3215 = vst [vmem:[#allocation2 + $0x10] sm:$0xff] %v3211_v58  ;;  %v3212_v54 = vadd.f32 %v3206_v40, %v4980_v17  ;;  %3972 = vmatprep.subr.bf16.mxu0 (!%p3698_p1), %v4436_v36 }
 0xf89   : > { %3216 = vst [vmem:[#allocation2 + $0x18] sm:$0xff] %v3212_v54 }
 0xf8a   : > { %3973 = vmatpush3.bf16.msra.mxu0 %v4328_v7 }
 0xf8b   : > { %3974 = vmatprep.subr.bf16.mxu0 %v4436_v36 }
 0xf8e   : > { %3975 = vmatpush3.bf16.msra.mxu0 %v4329_v11 }
 0xf8f   : > { %3976 = vmatprep.subr.bf16.mxu0 %v4436_v36 }
 0xf92   : > { %3977 = vmatpush3.bf16.msra.mxu0 %v4330_v14 }
 0xf93   : > { %3978 = vmatprep.subr.bf16.mxu0 %v4436_v36 }
 0xf96   : > { %3979 = vmatpush3.bf16.msra.mxu0 %v4331_v24 }
 0xf97   : > { %3980 = vmatprep.subr.bf16.mxu0 %v4436_v36 }
 0xf9a   : > { %3981 = vmatpush3.bf16.msra.mxu0 %v4332_v25 }
 0xf9b   : > { %3982 = vmatprep.subr.bf16.mxu0 %v4436_v36 }
 0xf9e   : > { %3983 = vmatpush3.bf16.msra.mxu0 %v4333_v26 }
0x1004   : > { %v3226_v17 = vpop.xlane.xlu0 %3225 }
0x1005   : > { %v3227_v57 = vmul.f32 0.0078125, %v3226_v17 }
0x1007   : > { %v3228_v23 = vsub.f32 %v3209_v47, %v3227_v57 }
0x1009   : > { %v3229_v35 = vmul.f32 %v3228_v23, %v3228_v23 }
0x100b   : > { %v3230_v38 = vsel %vm3223_vm3, %v3229_v35, 0.0 }
0x100c   : > { %3231 = vadd.xlane.f32.xlu0 %v3230_v38 }
0x1099   : > { %v3232_v60 = vpop.xlane.xlu0 %3231 }
0x109a   : > { %v3233_v27 = vmul.f32 0.0078125, %v3232_v60 }
0x109c   : > { %v3234_v28 = vadd.f32 1e-06, %v3233_v27 }
0x109e   : > { %4334 = vrsqrt.f32 %v3234_v28 }
0x10a8   : > { %v4335_v59 = vpop.eup %4334 }
0x10a9   : > { %v3236_v29 = vmul.f32 %v4335_v59, %v3228_v23 }
0x10ab   : > { %v3237_v9 = vmul.f32 %v3236_v29, %v3221_v61 }
0x10ad   : > { %v3238_v30 = vadd.f32 %v3237_v9, %v3222_v6 }
0x10af   : > { %v3239_v31 = vpack.c.bf16 %v3238_v30, %v3238_v30 }
0x10b1   : > { %3985 = vmatmul.mubr.bf16.vlgmr.msra.gmra.mrb[0].mxu0 %v3239_v31 }
0x1184   : > { %v3339_v12 = vpop.f32.mrb[0].mxu0 }
0x1185   : > { %v3340_v32 = vadd.f32 %v3339_v12, %v3256_v4  ;;  %v3986_v3 = vpop.f32.mrb[1].mxu0 }
0x1186   : > { %v3342_v2 = vpop.f32.mrb[2].mxu0 }
0x1187   : > { %3345 = vst [vmem:[%s4681_s17] sm:$0x1] %v3340_v32  ;;  %v3987_v33 = vpop.f32.mrb[3].mxu0 }
0x1188 PF: > { %s5411_s25 = sld [smem:[#allocation9_spill]]  ;;  %s5413_s2 = sld [smem:[#allocation29_spill]] }
0x1189   : > { %s3359_s27 = sshll.u32 %s4681_s17, 4  ;;  %s5415_s1 = sand.u32 1, %s4406_s30   ;;  %s3360_s27 = int_to_ptr.vmem [resolvable:$true] %s3359_s27 }
0x118a   : > { %s3347_s0 = scalar_lea.sflag [#allocation4], %s5415_s1  ;;  %s4336_s22 = scalar_lea.vmem %s3360_s27, 16 }
0x118b   : > { %p4337_p2 = scmp.ne.s32.totalorder %s3360_s27, %s4336_s22  ;;  %s4438_s6 = smov [#allocation3]  }
0x118c   : > { %s4340_s23 = sshll.u32 %s4438_s6, 4  ;;  %s4341_s23 = int_to_ptr.vmem [resolvable:$false] %s4340_s23 }
0x118d   : > { %p4338_p4 = pnand %p4337_p2, %p4588_p3  ;;  %s4342_s19 = scalar_lea.vmem %s4341_s23, 32 }
0x118e   : > { %s3707_s29 = sshll.u32 %s5411_s25, 4  ;;  %s5414_s5 = smov %s5413_s2 }
0x118f   : > { %s5279_s15 = scalar_lea.hbm %s5413_s2, %s3707_s29  ;;  %p4339_p5 = pneg %p4338_p4 }
0x1190   : > { %p4343_p6 = scmp.lt.s32.totalorder %s3360_s27, %s4341_s23  ;;  %p4344_p7 = scmp.lt.s32.totalorder %s4342_s19, %s4336_s22 }
0x1192   : > { %p4345_p8 = por %p4344_p7, %p4343_p6 }
0x1194   : > { %p4346_p10 = pnand %p4345_p8, %p4339_p5 }
0x1196   : > { %4349 = shalt.err (!%p4346_p10)
}
0x1197   : > { %s4350_s17 = scalar_lea.hbm %s5279_s15, 16  ;;  %s4354_s26 = scalar_lea.hbm %s5414_s5, 32 }
0x1198   : > { %p4351_p11 = scmp.ne.s32.totalorder %s5279_s15, %s4350_s17  ;;  %p4355_p0 = scmp.lt.u32.totalorder %s5279_s15, %s5414_s5 }
0x1199   : > { %p4356_p1 = scmp.lt.u32.totalorder %s4354_s26, %s4350_s17  ;;  %p4358_p4 = scmp.lt.u32.totalorder %s4350_s17, %s5279_s15 }
0x119a   : > { %p4352_p12 = pnand %p4351_p11, %p4588_p3 }
0x119b   : > { %p4357_p2 = por %p4356_p1, %p4355_p0 }
0x119c   : > { %p4353_p13 = pneg %p4352_p12 }
0x119d   : > { %p4359_p5 = por %p4358_p4, %p4357_p2 }
0x119f   : > { %p4360_p6 = pnand %p4359_p5, %p4353_p13 }
0x11a1   : > { %4363 = shalt.err (!%p4360_p6)
}
0x11a2   : > { %4010 = dma.vmem_to_hbm [thread:$0]  (%p4588_p3), %s3360_s27, 16, %s5279_s15, %s3347_s0  }
0x11a3 PF: > { %s5416_s20 = sld [smem:[#allocation12_spill]]  ;;  %s5417_s21 = sld [smem:[#allocation6_spill]] }
0x11a9   : > { %p4016_p7 = scmp.ge.s32.totalorder %s5416_s20, 2  ;;  %s3371_s1 = sand.u32 1, %s5417_s21  }
0x11aa   : > { %s3372_s22 = scalar_lea.sflag [#allocation4], %s3371_s1 }
0x11ab   : > { %p4013_p8 = pnand %p4016_p7, %p4598_p9 }
0x11ad   : > { %4397 = dma.done.wait (!%p4013_p8), %s3372_s22, 16  }
0x11ae   : > { %4399 = vsyncadd (!%p4013_p8), %s3372_s22, 4294967280  ;;  %s32_s23 = sadd.s32 1, %s5416_s20   ;;  %s5419_s6 = sld [smem:[#allocation7_spill]] }
0x11af   : > { %p29_p10 = scmp.ge.s32.totalorder %s32_s23, 6   ;;  %s5420_s20 = sld [smem:[#allocation17_spill]] }
0x11b0   : > { %s5421_s21 = sld [smem:[#allocation10_spill]]  ;;  %s5422_s1 = sld [smem:[#allocation11_spill]] }
0x11b1   : > { %s5423_s22 = sld [smem:[#allocation13_spill]]  ;;  %s5424_s2 = sld [smem:[#allocation15_spill]] }
0x11b2   : > { %s5425_s0 = smov %s4406_s30  ;;  %31 = sbr.rel (!%p29_p10) target bundleno = 18 (0x12), region = 175 }
0x11b4   : > { %s5426_s30 = smov %s5419_s6 }
0x11b9   :  { %3376 = vsyncpa [#allocation4], 1 }
0x11ba   :  { %3378 = vsyncpa [#allocation4 + $0x1], 1 }

</bundles_post_ra>
